<compile_context>
chip_gen: v5e
topology: v5e:2x2
jax: 0.10.0
libtpu: 0.0.40
codegen_flags: <defaults>
</compile_context>

<pallas_src>
import math

import jax
import jax.numpy as jnp
import numpy as np
from jax import lax
from jax.experimental import pallas as pl
from jax.experimental.pallas import tpu as pltpu


# ----------------------------------------------------------------------------- kernel

def _dynamics_kernel(x_ref, wih0_ref, whh0_ref, b0_ref, w1_ref, b1_ref,
                     wAB_ref, bAB_ref, Tc_ref, Gc_ref, dt_ref,
                     out_ref,
                     g0_ref, h2_ref):
    T, S = out_ref.shape
    H = whh0_ref.shape[0]

    x = x_ref[...]                                    # (T, S+A)
    whh0 = whh0_ref[...]                              # (H, 4H)
    w1 = w1_ref[...]                                  # (2H, 4H) stacked [Wih1; Whh1]
    b1 = b1_ref[...]                                  # (1, 4H)
    dt = dt_ref[0, 0]                                 # SMEM scalar

    # --- hoisted: layer-0 input projection for ALL timesteps (one (T,K)@(K,4H) matmul) ---
    g0_ref[...] = (jnp.dot(x, wih0_ref[...], preferred_element_type=jnp.float32)
                   + b0_ref[...])                     # (T, 4H)

    def gate_math(gates, c):
        # gates: (1, 4H), PyTorch gate order i, f, g, o.
        # One sigmoid + one tanh over the full vreg (EUP cost is per-push, not per-lane).
        sg = jax.nn.sigmoid(gates)
        th = jnp.tanh(gates)
        i_g = sg[:, 0 * H:1 * H]
        f_g = sg[:, 1 * H:2 * H]
        g_g = th[:, 2 * H:3 * H]
        o_g = sg[:, 3 * H:4 * H]
        c_new = f_g * c + i_g * g_g
        h_new = o_g * jnp.tanh(c_new)
        return h_new, c_new

    # --- serial recurrence: only the LSTM cells live here ---
    def body(t, carry):
        h1, c1, h2, c2 = carry
        # layer 0: input projection already precomputed; only the recurrent matmul remains.
        g0 = g0_ref[pl.ds(t, 1), :] + jnp.dot(h1, whh0,
                                              preferred_element_type=jnp.float32)
        h1, c1 = gate_math(g0, c1)
        # layer 1: single fused gate matmul on concat([h1_new, h2_old]).
        h12 = jnp.concatenate([h1, h2], axis=-1)      # (1, 2H)
        g1 = jnp.dot(h12, w1, preferred_element_type=jnp.float32) + b1
        h2, c2 = gate_math(g1, c2)
        h2_ref[pl.ds(t, 1), :] = h2
        return (h1, c1, h2, c2)

    zeros = jnp.zeros((1, H), jnp.float32)
    lax.fori_loop(0, T, body, (zeros, zeros, zeros, zeros), unroll=True)

    # --- hoisted out of the loop: T-batched projections + dynamics update ---
    h2_all = h2_ref[...]                                                       # (T, H)
    AB = (jnp.dot(h2_all, wAB_ref[...], preferred_element_type=jnp.float32)
          + bAB_ref[...])                                                      # (T, S*S+S*A)
    sa_rep = jnp.dot(x, Tc_ref[...], preferred_element_type=jnp.float32)       # (T, S*S+S*A)
    ds = jnp.dot(AB * sa_rep, Gc_ref[...], preferred_element_type=jnp.float32) # (T, S)
    out_ref[...] = x[:, 0:S] + ds * dt                                         # single store


# ----------------------------------------------------------------------------- wrapper

def dynamics_forward(state_seq, action_seq, params, dt):
    T, S = state_seq.shape
    A = action_seq.shape[1]
    H = params["w_hh_l0"].shape[1]
    f32 = jnp.float32

    x = jnp.concatenate([state_seq, action_seq], axis=-1).astype(f32)          # (T, S+A)

    # pre-transposed / fused parameters (glue, plain JAX, one-time cost)
    wih0 = params["w_ih_l0"].T.astype(f32)                                     # (S+A, 4H)
    whh0 = params["w_hh_l0"].T.astype(f32)                                     # (H, 4H)
    b0 = (params["b_ih_l0"] + params["b_hh_l0"]).reshape(1, 4 * H).astype(f32)
    w1 = jnp.concatenate([params["w_ih_l1"].T, params["w_hh_l1"].T],
                         axis=0).astype(f32)                                   # (2H, 4H)
    b1 = (params["b_ih_l1"] + params["b_hh_l1"]).reshape(1, 4 * H).astype(f32)
    wAB = jnp.concatenate([params["fc_A_w"].T, params["fc_B_w"].T],
                          axis=1).astype(f32)                                  # (H, S*S+S*A)
    bAB = jnp.concatenate([params["fc_A_b"], params["fc_B_b"]]
                          ).reshape(1, S * S + S * A).astype(f32)

    # combined indicator matrices: replicate [s|a] per row of [A|B], then group-sum rows
    TS = (jnp.arange(S * S)[None, :] % S == jnp.arange(S)[:, None]).astype(f32)   # (S, S*S)
    TA = (jnp.arange(S * A)[None, :] % A == jnp.arange(A)[:, None]).astype(f32)   # (A, S*A)
    GS = (jnp.arange(S * S)[:, None] // S == jnp.arange(S)[None, :]).astype(f32)  # (S*S, S)
    GA = (jnp.arange(S * A)[:, None] // A == jnp.arange(S)[None, :]).astype(f32)  # (S*A, S)
    Tc = jnp.zeros((S + A, S * S + S * A), f32)
    Tc = Tc.at[:S, :S * S].set(TS).at[S:, S * S:].set(TA)                      # (S+A, S*S+S*A)
    Gc = jnp.concatenate([GS, GA], axis=0)                                     # (S*S+S*A, S)

    dt_arr = jnp.array([[dt]], dtype=f32)                                      # SMEM scalar

    vmem_inputs = [x, wih0, whh0, b0, w1, b1, wAB, bAB, Tc, Gc]
    in_specs = [pl.BlockSpec(a.shape, lambda i, n=a.ndim: (0,) * n) for a in vmem_inputs]
    in_specs.append(pl.BlockSpec(memory_space=pltpu.MemorySpace.SMEM))         # dt

    return pl.pallas_call(
        _dynamics_kernel,
        out_shape=jax.ShapeDtypeStruct((T, S), f32),
        grid=(1,),
        in_specs=in_specs,
        out_specs=pl.BlockSpec((T, S), lambda i: (0, 0)),
        scratch_shapes=[pltpu.VMEM((T, 4 * H), f32),   # precomputed layer-0 gate inputs
                        pltpu.VMEM((T, H), f32)],      # h2 (lstm output) for all timesteps
        compiler_params=pltpu.CompilerParams(dimension_semantics=("arbitrary",)),
    )(*vmem_inputs, dt_arr)


# ----------------------------------------------------------------------------- reference (pure JAX)

def reference_forward(state_seq, action_seq, params, dt):
    T, S = state_seq.shape
    A = action_seq.shape[1]
    H = params["w_hh_l0"].shape[1]
    x = jnp.concatenate([state_seq, action_seq], axis=-1)

    def run_layer(xs, wih, whh, bih, bhh):
        def step(carry, x_t):
            h, c = carry
            gates = x_t @ wih.T + h @ whh.T + bih + bhh
            i = jax.nn.sigmoid(gates[0:H]); f = jax.nn.sigmoid(gates[H:2 * H])
            g = jnp.tanh(gates[2 * H:3 * H]); o = jax.nn.sigmoid(gates[3 * H:4 * H])
            c = f * c + i * g
            h = o * jnp.tanh(c)
            return (h, c), h
        _, hs = lax.scan(step, (jnp.zeros(H), jnp.zeros(H)), xs)
        return hs

    h1 = run_layer(x, params["w_ih_l0"], params["w_hh_l0"], params["b_ih_l0"], params["b_hh_l0"])
    h2 = run_layer(h1, params["w_ih_l1"], params["w_hh_l1"], params["b_ih_l1"], params["b_hh_l1"])
    Am = (h2 @ params["fc_A_w"].T + params["fc_A_b"]).reshape(T, S, S)
    Bm = (h2 @ params["fc_B_w"].T + params["fc_B_b"]).reshape(T, S, A)
    ds = jnp.einsum("tij,tj->ti", Am, state_seq) + jnp.einsum("tij,tj->ti", Bm, action_seq)
    return state_seq + ds * dt


# ----------------------------------------------------------------------------- main

def init_params(key, S, A, H):
    ks = jax.random.split(key, 12)
    u = lambda k, shape, bound: jax.random.uniform(k, shape, jnp.float32, -bound, bound)
    bl = 1.0 / math.sqrt(H)
    return {
        "w_ih_l0": u(ks[0], (4 * H, S + A), bl), "w_hh_l0": u(ks[1], (4 * H, H), bl),
        "b_ih_l0": u(ks[2], (4 * H,), bl),       "b_hh_l0": u(ks[3], (4 * H,), bl),
        "w_ih_l1": u(ks[4], (4 * H, H), bl),     "w_hh_l1": u(ks[5], (4 * H, H), bl),
        "b_ih_l1": u(ks[6], (4 * H,), bl),       "b_hh_l1": u(ks[7], (4 * H,), bl),
        "fc_A_w": u(ks[8], (S * S, H), bl),      "fc_A_b": u(ks[9], (S * S,), bl),
        "fc_B_w": u(ks[10], (S * A, H), bl),     "fc_B_b": u(ks[11], (S * A,), bl),
    }


if __name__ == "__main__":
    STATE, ACTION, HIDDEN, T, DT = 4, 2, 32, 8, 0.1

    key = jax.random.PRNGKey(0)
    kp, ks, ka = jax.random.split(key, 3)
    params = init_params(kp, STATE, ACTION, HIDDEN)
    state_seq = jax.random.normal(ks, (T, STATE), jnp.float32)
    action_seq = jax.random.normal(ka, (T, ACTION), jnp.float32)

    out = dynamics_forward(state_seq, action_seq, params, DT)
    out = jax.block_until_ready(out)

    ref = jax.block_until_ready(reference_forward(state_seq, action_seq, params, DT))
    np.testing.assert_allclose(np.asarray(out), np.asarray(ref), rtol=1e-5, atol=1e-4)

    print("KERNEL_OK")
</pallas_src>

<mosaic_0001>
module attributes {stable_mosaic.version = 11 : i64} {
  func.func @_dynamics_kernel(%arg0: i32, %arg1: memref<8x6xf32, #tpu.memory_space<vmem>>, %arg2: memref<6x128xf32, #tpu.memory_space<vmem>>, %arg3: memref<32x128xf32, #tpu.memory_space<vmem>>, %arg4: memref<1x128xf32, #tpu.memory_space<vmem>>, %arg5: memref<64x128xf32, #tpu.memory_space<vmem>>, %arg6: memref<1x128xf32, #tpu.memory_space<vmem>>, %arg7: memref<32x24xf32, #tpu.memory_space<vmem>>, %arg8: memref<1x24xf32, #tpu.memory_space<vmem>>, %arg9: memref<6x24xf32, #tpu.memory_space<vmem>>, %arg10: memref<24x4xf32, #tpu.memory_space<vmem>>, %arg11: memref<1x1xf32, #tpu.memory_space<smem>>, %arg12: memref<8x4xf32, #tpu.memory_space<vmem>>, %arg13: memref<8x128xf32, #tpu.memory_space<vmem>>, %arg14: memref<8x32xf32, #tpu.memory_space<vmem>>) attributes {dimension_semantics = [#tpu.dimension_semantics<arbitrary>], iteration_bounds = array<i64: 1>, scalar_prefetch = 0 : i64, scratch_operands = 2 : i64, tpu.core_type = #tpu.core_type<tc>, window_params = [{pipeline_mode = #tpu.pipeline_mode<synchronous>, transform_indices = @transform_0, window_bounds = array<i64: 8, 6>}, {pipeline_mode = #tpu.pipeline_mode<synchronous>, transform_indices = @transform_1, window_bounds = array<i64: 6, 128>}, {pipeline_mode = #tpu.pipeline_mode<synchronous>, transform_indices = @transform_2, window_bounds = array<i64: 32, 128>}, {pipeline_mode = #tpu.pipeline_mode<synchronous>, transform_indices = @transform_3, window_bounds = array<i64: 1, 128>}, {pipeline_mode = #tpu.pipeline_mode<synchronous>, transform_indices = @transform_4, window_bounds = array<i64: 64, 128>}, {pipeline_mode = #tpu.pipeline_mode<synchronous>, transform_indices = @transform_5, window_bounds = array<i64: 1, 128>}, {pipeline_mode = #tpu.pipeline_mode<synchronous>, transform_indices = @transform_6, window_bounds = array<i64: 32, 24>}, {pipeline_mode = #tpu.pipeline_mode<synchronous>, transform_indices = @transform_7, window_bounds = array<i64: 1, 24>}, {pipeline_mode = #tpu.pipeline_mode<synchronous>, transform_indices = @transform_8, window_bounds = array<i64: 6, 24>}, {pipeline_mode = #tpu.pipeline_mode<synchronous>, transform_indices = @transform_9, window_bounds = array<i64: 24, 4>}, {transform_indices = @transform_10, window_bounds = array<i64: 1, 1>}, {pipeline_mode = #tpu.pipeline_mode<synchronous>, transform_indices = @transform_11, window_bounds = array<i64: 8, 4>}]} {
    %c0 = arith.constant 0 : index
    %c0_0 = arith.constant 0 : index
    %0 = vector.load %arg1[%c0, %c0_0] : memref<8x6xf32, #tpu.memory_space<vmem>>, vector<8x6xf32>
    %c0_1 = arith.constant 0 : index
    %c0_2 = arith.constant 0 : index
    %1 = vector.load %arg3[%c0_1, %c0_2] : memref<32x128xf32, #tpu.memory_space<vmem>>, vector<32x128xf32>
    %c0_3 = arith.constant 0 : index
    %c0_4 = arith.constant 0 : index
    %2 = vector.load %arg5[%c0_3, %c0_4] : memref<64x128xf32, #tpu.memory_space<vmem>>, vector<64x128xf32>
    %c0_5 = arith.constant 0 : index
    %c0_6 = arith.constant 0 : index
    %3 = vector.load %arg6[%c0_5, %c0_6] : memref<1x128xf32, #tpu.memory_space<vmem>>, vector<1x128xf32>
    %c0_7 = arith.constant 0 : index
    %c0_8 = arith.constant 0 : index
    %4 = memref.load %arg11[%c0_7, %c0_8] : memref<1x1xf32, #tpu.memory_space<smem>>
    %c0_9 = arith.constant 0 : index
    %c0_10 = arith.constant 0 : index
    %5 = vector.load %arg2[%c0_9, %c0_10] : memref<6x128xf32, #tpu.memory_space<vmem>>, vector<6x128xf32>
    %cst = arith.constant dense<0.000000e+00> : vector<8x128xf32>
    %6 = tpu.matmul %0, %5, %cst {dimension_numbers = #tpu.dot_dimension_numbers<[1], [0], [0], [1], [0, 0, 1, 1], [], []>} : vector<8x6xf32>, vector<6x128xf32>, vector<8x128xf32> -> vector<8x128xf32>
    %c0_11 = arith.constant 0 : index
    %c0_12 = arith.constant 0 : index
    %7 = vector.load %arg4[%c0_11, %c0_12] : memref<1x128xf32, #tpu.memory_space<vmem>>, vector<1x128xf32>
    %8 = vector.broadcast %7 : vector<1x128xf32> to vector<8x128xf32>
    %9 = arith.addf %6, %8 : vector<8x128xf32>
    %c0_13 = arith.constant 0 : index
    %c0_14 = arith.constant 0 : index
    %10 = vector.load %arg13[%c0_13, %c0_14] : memref<8x128xf32, #tpu.memory_space<vmem>>, vector<8x128xf32>
    tpu.vector_store %arg13[%c0_13, %c0_14], %9 {strides = array<i32>} : memref<8x128xf32, #tpu.memory_space<vmem>>, vector<8x128xf32>,
    %cst_15 = arith.constant 0.000000e+00 : f32
    %11 = vector.broadcast %cst_15 : f32 to vector<1x32xf32>
    %c0_i32 = arith.constant 0 : i32
    %12 = arith.index_cast %c0_i32 : i32 to index
    %c0_16 = arith.constant 0 : index
    %13 = vector.load %arg13[%12, %c0_16] : memref<8x128xf32, #tpu.memory_space<vmem>>, vector<1x128xf32>
    %cst_17 = arith.constant dense<0.000000e+00> : vector<1x128xf32>
    %14 = tpu.matmul %11, %1, %cst_17 {dimension_numbers = #tpu.dot_dimension_numbers<[1], [0], [0], [1], [0, 0, 1, 1], [], []>} : vector<1x32xf32>, vector<32x128xf32>, vector<1x128xf32> -> vector<1x128xf32>
    %15 = arith.addf %13, %14 : vector<1x128xf32>
    %16 = arith.negf %15 : vector<1x128xf32>
    %17 = math.exp %16 : vector<1x128xf32>
    %cst_18 = arith.constant 1.000000e+00 : f32
    %18 = vector.broadcast %cst_18 : f32 to vector<1x128xf32>
    %19 = arith.addf %18, %17 : vector<1x128xf32>
    %20 = arith.divf %18, %19 : vector<1x128xf32>
    %21 = math.tanh %15 : vector<1x128xf32>
    %22 = vector.extract_strided_slice %20 {offsets = [0, 0], sizes = [1, 32], strides = [1, 1]} : vector<1x128xf32> to vector<1x32xf32>
    %23 = vector.extract_strided_slice %20 {offsets = [0, 32], sizes = [1, 32], strides = [1, 1]} : vector<1x128xf32> to vector<1x32xf32>
    %24 = vector.extract_strided_slice %21 {offsets = [0, 64], sizes = [1, 32], strides = [1, 1]} : vector<1x128xf32> to vector<1x32xf32>
    %25 = vector.extract_strided_slice %20 {offsets = [0, 96], sizes = [1, 32], strides = [1, 1]} : vector<1x128xf32> to vector<1x32xf32>
    %26 = arith.mulf %23, %11 : vector<1x32xf32>
    %27 = arith.mulf %22, %24 : vector<1x32xf32>
    %28 = arith.addf %26, %27 : vector<1x32xf32>
    %29 = math.tanh %28 : vector<1x32xf32>
    %30 = arith.mulf %25, %29 : vector<1x32xf32>
    %31 = tpu.concatenate %30, %11 in 1 : vector<1x32xf32>, vector<1x32xf32> -> vector<1x64xf32>
    %cst_19 = arith.constant dense<0.000000e+00> : vector<1x128xf32>
    %32 = tpu.matmul %31, %2, %cst_19 {dimension_numbers = #tpu.dot_dimension_numbers<[1], [0], [0], [1], [0, 0, 1, 1], [], []>} : vector<1x64xf32>, vector<64x128xf32>, vector<1x128xf32> -> vector<1x128xf32>
    %33 = arith.addf %32, %3 : vector<1x128xf32>
    %34 = arith.negf %33 : vector<1x128xf32>
    %35 = math.exp %34 : vector<1x128xf32>
    %cst_20 = arith.constant 1.000000e+00 : f32
    %36 = vector.broadcast %cst_20 : f32 to vector<1x128xf32>
    %37 = arith.addf %36, %35 : vector<1x128xf32>
    %38 = arith.divf %36, %37 : vector<1x128xf32>
    %39 = math.tanh %33 : vector<1x128xf32>
    %40 = vector.extract_strided_slice %38 {offsets = [0, 0], sizes = [1, 32], strides = [1, 1]} : vector<1x128xf32> to vector<1x32xf32>
    %41 = vector.extract_strided_slice %38 {offsets = [0, 32], sizes = [1, 32], strides = [1, 1]} : vector<1x128xf32> to vector<1x32xf32>
    %42 = vector.extract_strided_slice %39 {offsets = [0, 64], sizes = [1, 32], strides = [1, 1]} : vector<1x128xf32> to vector<1x32xf32>
    %43 = vector.extract_strided_slice %38 {offsets = [0, 96], sizes = [1, 32], strides = [1, 1]} : vector<1x128xf32> to vector<1x32xf32>
    %44 = arith.mulf %41, %11 : vector<1x32xf32>
    %45 = arith.mulf %40, %42 : vector<1x32xf32>
    %46 = arith.addf %44, %45 : vector<1x32xf32>
    %47 = math.tanh %46 : vector<1x32xf32>
    %48 = arith.mulf %43, %47 : vector<1x32xf32>
    %49 = arith.index_cast %c0_i32 : i32 to index
    %c0_21 = arith.constant 0 : index
    %50 = vector.load %arg14[%49, %c0_21] : memref<8x32xf32, #tpu.memory_space<vmem>>, vector<1x32xf32>
    tpu.vector_store %arg14[%49, %c0_21], %48 {strides = array<i32>} : memref<8x32xf32, #tpu.memory_space<vmem>>, vector<1x32xf32>,
    %c1_i32 = arith.constant 1 : i32
    %51 = arith.index_cast %c1_i32 : i32 to index
    %c0_22 = arith.constant 0 : index
    %52 = vector.load %arg13[%51, %c0_22] : memref<8x128xf32, #tpu.memory_space<vmem>>, vector<1x128xf32>
    %cst_23 = arith.constant dense<0.000000e+00> : vector<1x128xf32>
    %53 = tpu.matmul %30, %1, %cst_23 {dimension_numbers = #tpu.dot_dimension_numbers<[1], [0], [0], [1], [0, 0, 1, 1], [], []>} : vector<1x32xf32>, vector<32x128xf32>, vector<1x128xf32> -> vector<1x128xf32>
    %54 = arith.addf %52, %53 : vector<1x128xf32>
    %55 = arith.negf %54 : vector<1x128xf32>
    %56 = math.exp %55 : vector<1x128xf32>
    %cst_24 = arith.constant 1.000000e+00 : f32
    %57 = vector.broadcast %cst_24 : f32 to vector<1x128xf32>
    %58 = arith.addf %57, %56 : vector<1x128xf32>
    %59 = arith.divf %57, %58 : vector<1x128xf32>
    %60 = math.tanh %54 : vector<1x128xf32>
    %61 = vector.extract_strided_slice %59 {offsets = [0, 0], sizes = [1, 32], strides = [1, 1]} : vector<1x128xf32> to vector<1x32xf32>
    %62 = vector.extract_strided_slice %59 {offsets = [0, 32], sizes = [1, 32], strides = [1, 1]} : vector<1x128xf32> to vector<1x32xf32>
    %63 = vector.extract_strided_slice %60 {offsets = [0, 64], sizes = [1, 32], strides = [1, 1]} : vector<1x128xf32> to vector<1x32xf32>
    %64 = vector.extract_strided_slice %59 {offsets = [0, 96], sizes = [1, 32], strides = [1, 1]} : vector<1x128xf32> to vector<1x32xf32>
    %65 = arith.mulf %62, %28 : vector<1x32xf32>
    %66 = arith.mulf %61, %63 : vector<1x32xf32>
    %67 = arith.addf %65, %66 : vector<1x32xf32>
    %68 = math.tanh %67 : vector<1x32xf32>
    %69 = arith.mulf %64, %68 : vector<1x32xf32>
    %70 = tpu.concatenate %69, %48 in 1 : vector<1x32xf32>, vector<1x32xf32> -> vector<1x64xf32>
    %cst_25 = arith.constant dense<0.000000e+00> : vector<1x128xf32>
    %71 = tpu.matmul %70, %2, %cst_25 {dimension_numbers = #tpu.dot_dimension_numbers<[1], [0], [0], [1], [0, 0, 1, 1], [], []>} : vector<1x64xf32>, vector<64x128xf32>, vector<1x128xf32> -> vector<1x128xf32>
    %72 = arith.addf %71, %3 : vector<1x128xf32>
    %73 = arith.negf %72 : vector<1x128xf32>
    %74 = math.exp %73 : vector<1x128xf32>
    %cst_26 = arith.constant 1.000000e+00 : f32
    %75 = vector.broadcast %cst_26 : f32 to vector<1x128xf32>
    %76 = arith.addf %75, %74 : vector<1x128xf32>
    %77 = arith.divf %75, %76 : vector<1x128xf32>
    %78 = math.tanh %72 : vector<1x128xf32>
    %79 = vector.extract_strided_slice %77 {offsets = [0, 0], sizes = [1, 32], strides = [1, 1]} : vector<1x128xf32> to vector<1x32xf32>
    %80 = vector.extract_strided_slice %77 {offsets = [0, 32], sizes = [1, 32], strides = [1, 1]} : vector<1x128xf32> to vector<1x32xf32>
    %81 = vector.extract_strided_slice %78 {offsets = [0, 64], sizes = [1, 32], strides = [1, 1]} : vector<1x128xf32> to vector<1x32xf32>
    %82 = vector.extract_strided_slice %77 {offsets = [0, 96], sizes = [1, 32], strides = [1, 1]} : vector<1x128xf32> to vector<1x32xf32>
    %83 = arith.mulf %80, %46 : vector<1x32xf32>
    %84 = arith.mulf %79, %81 : vector<1x32xf32>
    %85 = arith.addf %83, %84 : vector<1x32xf32>
    %86 = math.tanh %85 : vector<1x32xf32>
    %87 = arith.mulf %82, %86 : vector<1x32xf32>
    %88 = arith.index_cast %c1_i32 : i32 to index
    %c0_27 = arith.constant 0 : index
    %89 = vector.load %arg14[%88, %c0_27] : memref<8x32xf32, #tpu.memory_space<vmem>>, vector<1x32xf32>
    tpu.vector_store %arg14[%88, %c0_27], %87 {strides = array<i32>} : memref<8x32xf32, #tpu.memory_space<vmem>>, vector<1x32xf32>,
    %c2_i32 = arith.constant 2 : i32
    %90 = arith.index_cast %c2_i32 : i32 to index
    %c0_28 = arith.constant 0 : index
    %91 = vector.load %arg13[%90, %c0_28] : memref<8x128xf32, #tpu.memory_space<vmem>>, vector<1x128xf32>
    %cst_29 = arith.constant dense<0.000000e+00> : vector<1x128xf32>
    %92 = tpu.matmul %69, %1, %cst_29 {dimension_numbers = #tpu.dot_dimension_numbers<[1], [0], [0], [1], [0, 0, 1, 1], [], []>} : vector<1x32xf32>, vector<32x128xf32>, vector<1x128xf32> -> vector<1x128xf32>
    %93 = arith.addf %91, %92 : vector<1x128xf32>
    %94 = arith.negf %93 : vector<1x128xf32>
    %95 = math.exp %94 : vector<1x128xf32>
    %cst_30 = arith.constant 1.000000e+00 : f32
    %96 = vector.broadcast %cst_30 : f32 to vector<1x128xf32>
    %97 = arith.addf %96, %95 : vector<1x128xf32>
    %98 = arith.divf %96, %97 : vector<1x128xf32>
    %99 = math.tanh %93 : vector<1x128xf32>
    %100 = vector.extract_strided_slice %98 {offsets = [0, 0], sizes = [1, 32], strides = [1, 1]} : vector<1x128xf32> to vector<1x32xf32>
    %101 = vector.extract_strided_slice %98 {offsets = [0, 32], sizes = [1, 32], strides = [1, 1]} : vector<1x128xf32> to vector<1x32xf32>
    %102 = vector.extract_strided_slice %99 {offsets = [0, 64], sizes = [1, 32], strides = [1, 1]} : vector<1x128xf32> to vector<1x32xf32>
    %103 = vector.extract_strided_slice %98 {offsets = [0, 96], sizes = [1, 32], strides = [1, 1]} : vector<1x128xf32> to vector<1x32xf32>
    %104 = arith.mulf %101, %67 : vector<1x32xf32>
    %105 = arith.mulf %100, %102 : vector<1x32xf32>
    %106 = arith.addf %104, %105 : vector<1x32xf32>
    %107 = math.tanh %106 : vector<1x32xf32>
    %108 = arith.mulf %103, %107 : vector<1x32xf32>
    %109 = tpu.concatenate %108, %87 in 1 : vector<1x32xf32>, vector<1x32xf32> -> vector<1x64xf32>
    %cst_31 = arith.constant dense<0.000000e+00> : vector<1x128xf32>
    %110 = tpu.matmul %109, %2, %cst_31 {dimension_numbers = #tpu.dot_dimension_numbers<[1], [0], [0], [1], [0, 0, 1, 1], [], []>} : vector<1x64xf32>, vector<64x128xf32>, vector<1x128xf32> -> vector<1x128xf32>
    %111 = arith.addf %110, %3 : vector<1x128xf32>
    %112 = arith.negf %111 : vector<1x128xf32>
    %113 = math.exp %112 : vector<1x128xf32>
    %cst_32 = arith.constant 1.000000e+00 : f32
    %114 = vector.broadcast %cst_32 : f32 to vector<1x128xf32>
    %115 = arith.addf %114, %113 : vector<1x128xf32>
    %116 = arith.divf %114, %115 : vector<1x128xf32>
    %117 = math.tanh %111 : vector<1x128xf32>
    %118 = vector.extract_strided_slice %116 {offsets = [0, 0], sizes = [1, 32], strides = [1, 1]} : vector<1x128xf32> to vector<1x32xf32>
    %119 = vector.extract_strided_slice %116 {offsets = [0, 32], sizes = [1, 32], strides = [1, 1]} : vector<1x128xf32> to vector<1x32xf32>
    %120 = vector.extract_strided_slice %117 {offsets = [0, 64], sizes = [1, 32], strides = [1, 1]} : vector<1x128xf32> to vector<1x32xf32>
    %121 = vector.extract_strided_slice %116 {offsets = [0, 96], sizes = [1, 32], strides = [1, 1]} : vector<1x128xf32> to vector<1x32xf32>
    %122 = arith.mulf %119, %85 : vector<1x32xf32>
    %123 = arith.mulf %118, %120 : vector<1x32xf32>
    %124 = arith.addf %122, %123 : vector<1x32xf32>
    %125 = math.tanh %124 : vector<1x32xf32>
    %126 = arith.mulf %121, %125 : vector<1x32xf32>
    %127 = arith.index_cast %c2_i32 : i32 to index
    %c0_33 = arith.constant 0 : index
    %128 = vector.load %arg14[%127, %c0_33] : memref<8x32xf32, #tpu.memory_space<vmem>>, vector<1x32xf32>
    tpu.vector_store %arg14[%127, %c0_33], %126 {strides = array<i32>} : memref<8x32xf32, #tpu.memory_space<vmem>>, vector<1x32xf32>,
    %c3_i32 = arith.constant 3 : i32
    %129 = arith.index_cast %c3_i32 : i32 to index
    %c0_34 = arith.constant 0 : index
    %130 = vector.load %arg13[%129, %c0_34] : memref<8x128xf32, #tpu.memory_space<vmem>>, vector<1x128xf32>
    %cst_35 = arith.constant dense<0.000000e+00> : vector<1x128xf32>
    %131 = tpu.matmul %108, %1, %cst_35 {dimension_numbers = #tpu.dot_dimension_numbers<[1], [0], [0], [1], [0, 0, 1, 1], [], []>} : vector<1x32xf32>, vector<32x128xf32>, vector<1x128xf32> -> vector<1x128xf32>
    %132 = arith.addf %130, %131 : vector<1x128xf32>
    %133 = arith.negf %132 : vector<1x128xf32>
    %134 = math.exp %133 : vector<1x128xf32>
    %cst_36 = arith.constant 1.000000e+00 : f32
    %135 = vector.broadcast %cst_36 : f32 to vector<1x128xf32>
    %136 = arith.addf %135, %134 : vector<1x128xf32>
    %137 = arith.divf %135, %136 : vector<1x128xf32>
    %138 = math.tanh %132 : vector<1x128xf32>
    %139 = vector.extract_strided_slice %137 {offsets = [0, 0], sizes = [1, 32], strides = [1, 1]} : vector<1x128xf32> to vector<1x32xf32>
    %140 = vector.extract_strided_slice %137 {offsets = [0, 32], sizes = [1, 32], strides = [1, 1]} : vector<1x128xf32> to vector<1x32xf32>
    %141 = vector.extract_strided_slice %138 {offsets = [0, 64], sizes = [1, 32], strides = [1, 1]} : vector<1x128xf32> to vector<1x32xf32>
    %142 = vector.extract_strided_slice %137 {offsets = [0, 96], sizes = [1, 32], strides = [1, 1]} : vector<1x128xf32> to vector<1x32xf32>
    %143 = arith.mulf %140, %106 : vector<1x32xf32>
    %144 = arith.mulf %139, %141 : vector<1x32xf32>
    %145 = arith.addf %143, %144 : vector<1x32xf32>
    %146 = math.tanh %145 : vector<1x32xf32>
    %147 = arith.mulf %142, %146 : vector<1x32xf32>
    %148 = tpu.concatenate %147, %126 in 1 : vector<1x32xf32>, vector<1x32xf32> -> vector<1x64xf32>
    %cst_37 = arith.constant dense<0.000000e+00> : vector<1x128xf32>
    %149 = tpu.matmul %148, %2, %cst_37 {dimension_numbers = #tpu.dot_dimension_numbers<[1], [0], [0], [1], [0, 0, 1, 1], [], []>} : vector<1x64xf32>, vector<64x128xf32>, vector<1x128xf32> -> vector<1x128xf32>
    %150 = arith.addf %149, %3 : vector<1x128xf32>
    %151 = arith.negf %150 : vector<1x128xf32>
    %152 = math.exp %151 : vector<1x128xf32>
    %cst_38 = arith.constant 1.000000e+00 : f32
    %153 = vector.broadcast %cst_38 : f32 to vector<1x128xf32>
    %154 = arith.addf %153, %152 : vector<1x128xf32>
    %155 = arith.divf %153, %154 : vector<1x128xf32>
    %156 = math.tanh %150 : vector<1x128xf32>
    %157 = vector.extract_strided_slice %155 {offsets = [0, 0], sizes = [1, 32], strides = [1, 1]} : vector<1x128xf32> to vector<1x32xf32>
    %158 = vector.extract_strided_slice %155 {offsets = [0, 32], sizes = [1, 32], strides = [1, 1]} : vector<1x128xf32> to vector<1x32xf32>
    %159 = vector.extract_strided_slice %156 {offsets = [0, 64], sizes = [1, 32], strides = [1, 1]} : vector<1x128xf32> to vector<1x32xf32>
    %160 = vector.extract_strided_slice %155 {offsets = [0, 96], sizes = [1, 32], strides = [1, 1]} : vector<1x128xf32> to vector<1x32xf32>
    %161 = arith.mulf %158, %124 : vector<1x32xf32>
    %162 = arith.mulf %157, %159 : vector<1x32xf32>
    %163 = arith.addf %161, %162 : vector<1x32xf32>
    %164 = math.tanh %163 : vector<1x32xf32>
    %165 = arith.mulf %160, %164 : vector<1x32xf32>
    %166 = arith.index_cast %c3_i32 : i32 to index
    %c0_39 = arith.constant 0 : index
    %167 = vector.load %arg14[%166, %c0_39] : memref<8x32xf32, #tpu.memory_space<vmem>>, vector<1x32xf32>
    tpu.vector_store %arg14[%166, %c0_39], %165 {strides = array<i32>} : memref<8x32xf32, #tpu.memory_space<vmem>>, vector<1x32xf32>,
    %c4_i32 = arith.constant 4 : i32
    %168 = arith.index_cast %c4_i32 : i32 to index
    %c0_40 = arith.constant 0 : index
    %169 = vector.load %arg13[%168, %c0_40] : memref<8x128xf32, #tpu.memory_space<vmem>>, vector<1x128xf32>
    %cst_41 = arith.constant dense<0.000000e+00> : vector<1x128xf32>
    %170 = tpu.matmul %147, %1, %cst_41 {dimension_numbers = #tpu.dot_dimension_numbers<[1], [0], [0], [1], [0, 0, 1, 1], [], []>} : vector<1x32xf32>, vector<32x128xf32>, vector<1x128xf32> -> vector<1x128xf32>
    %171 = arith.addf %169, %170 : vector<1x128xf32>
    %172 = arith.negf %171 : vector<1x128xf32>
    %173 = math.exp %172 : vector<1x128xf32>
    %cst_42 = arith.constant 1.000000e+00 : f32
    %174 = vector.broadcast %cst_42 : f32 to vector<1x128xf32>
    %175 = arith.addf %174, %173 : vector<1x128xf32>
    %176 = arith.divf %174, %175 : vector<1x128xf32>
    %177 = math.tanh %171 : vector<1x128xf32>
    %178 = vector.extract_strided_slice %176 {offsets = [0, 0], sizes = [1, 32], strides = [1, 1]} : vector<1x128xf32> to vector<1x32xf32>
    %179 = vector.extract_strided_slice %176 {offsets = [0, 32], sizes = [1, 32], strides = [1, 1]} : vector<1x128xf32> to vector<1x32xf32>
    %180 = vector.extract_strided_slice %177 {offsets = [0, 64], sizes = [1, 32], strides = [1, 1]} : vector<1x128xf32> to vector<1x32xf32>
    %181 = vector.extract_strided_slice %176 {offsets = [0, 96], sizes = [1, 32], strides = [1, 1]} : vector<1x128xf32> to vector<1x32xf32>
    %182 = arith.mulf %179, %145 : vector<1x32xf32>
    %183 = arith.mulf %178, %180 : vector<1x32xf32>
    %184 = arith.addf %182, %183 : vector<1x32xf32>
    %185 = math.tanh %184 : vector<1x32xf32>
    %186 = arith.mulf %181, %185 : vector<1x32xf32>
    %187 = tpu.concatenate %186, %165 in 1 : vector<1x32xf32>, vector<1x32xf32> -> vector<1x64xf32>
    %cst_43 = arith.constant dense<0.000000e+00> : vector<1x128xf32>
    %188 = tpu.matmul %187, %2, %cst_43 {dimension_numbers = #tpu.dot_dimension_numbers<[1], [0], [0], [1], [0, 0, 1, 1], [], []>} : vector<1x64xf32>, vector<64x128xf32>, vector<1x128xf32> -> vector<1x128xf32>
    %189 = arith.addf %188, %3 : vector<1x128xf32>
    %190 = arith.negf %189 : vector<1x128xf32>
    %191 = math.exp %190 : vector<1x128xf32>
    %cst_44 = arith.constant 1.000000e+00 : f32
    %192 = vector.broadcast %cst_44 : f32 to vector<1x128xf32>
    %193 = arith.addf %192, %191 : vector<1x128xf32>
    %194 = arith.divf %192, %193 : vector<1x128xf32>
    %195 = math.tanh %189 : vector<1x128xf32>
    %196 = vector.extract_strided_slice %194 {offsets = [0, 0], sizes = [1, 32], strides = [1, 1]} : vector<1x128xf32> to vector<1x32xf32>
    %197 = vector.extract_strided_slice %194 {offsets = [0, 32], sizes = [1, 32], strides = [1, 1]} : vector<1x128xf32> to vector<1x32xf32>
    %198 = vector.extract_strided_slice %195 {offsets = [0, 64], sizes = [1, 32], strides = [1, 1]} : vector<1x128xf32> to vector<1x32xf32>
    %199 = vector.extract_strided_slice %194 {offsets = [0, 96], sizes = [1, 32], strides = [1, 1]} : vector<1x128xf32> to vector<1x32xf32>
    %200 = arith.mulf %197, %163 : vector<1x32xf32>
    %201 = arith.mulf %196, %198 : vector<1x32xf32>
    %202 = arith.addf %200, %201 : vector<1x32xf32>
    %203 = math.tanh %202 : vector<1x32xf32>
    %204 = arith.mulf %199, %203 : vector<1x32xf32>
    %205 = arith.index_cast %c4_i32 : i32 to index
    %c0_45 = arith.constant 0 : index
    %206 = vector.load %arg14[%205, %c0_45] : memref<8x32xf32, #tpu.memory_space<vmem>>, vector<1x32xf32>
    tpu.vector_store %arg14[%205, %c0_45], %204 {strides = array<i32>} : memref<8x32xf32, #tpu.memory_space<vmem>>, vector<1x32xf32>,
    %c5_i32 = arith.constant 5 : i32
    %207 = arith.index_cast %c5_i32 : i32 to index
    %c0_46 = arith.constant 0 : index
    %208 = vector.load %arg13[%207, %c0_46] : memref<8x128xf32, #tpu.memory_space<vmem>>, vector<1x128xf32>
    %cst_47 = arith.constant dense<0.000000e+00> : vector<1x128xf32>
    %209 = tpu.matmul %186, %1, %cst_47 {dimension_numbers = #tpu.dot_dimension_numbers<[1], [0], [0], [1], [0, 0, 1, 1], [], []>} : vector<1x32xf32>, vector<32x128xf32>, vector<1x128xf32> -> vector<1x128xf32>
    %210 = arith.addf %208, %209 : vector<1x128xf32>
    %211 = arith.negf %210 : vector<1x128xf32>
    %212 = math.exp %211 : vector<1x128xf32>
    %cst_48 = arith.constant 1.000000e+00 : f32
    %213 = vector.broadcast %cst_48 : f32 to vector<1x128xf32>
    %214 = arith.addf %213, %212 : vector<1x128xf32>
    %215 = arith.divf %213, %214 : vector<1x128xf32>
    %216 = math.tanh %210 : vector<1x128xf32>
    %217 = vector.extract_strided_slice %215 {offsets = [0, 0], sizes = [1, 32], strides = [1, 1]} : vector<1x128xf32> to vector<1x32xf32>
    %218 = vector.extract_strided_slice %215 {offsets = [0, 32], sizes = [1, 32], strides = [1, 1]} : vector<1x128xf32> to vector<1x32xf32>
    %219 = vector.extract_strided_slice %216 {offsets = [0, 64], sizes = [1, 32], strides = [1, 1]} : vector<1x128xf32> to vector<1x32xf32>
    %220 = vector.extract_strided_slice %215 {offsets = [0, 96], sizes = [1, 32], strides = [1, 1]} : vector<1x128xf32> to vector<1x32xf32>
    %221 = arith.mulf %218, %184 : vector<1x32xf32>
    %222 = arith.mulf %217, %219 : vector<1x32xf32>
    %223 = arith.addf %221, %222 : vector<1x32xf32>
    %224 = math.tanh %223 : vector<1x32xf32>
    %225 = arith.mulf %220, %224 : vector<1x32xf32>
    %226 = tpu.concatenate %225, %204 in 1 : vector<1x32xf32>, vector<1x32xf32> -> vector<1x64xf32>
    %cst_49 = arith.constant dense<0.000000e+00> : vector<1x128xf32>
    %227 = tpu.matmul %226, %2, %cst_49 {dimension_numbers = #tpu.dot_dimension_numbers<[1], [0], [0], [1], [0, 0, 1, 1], [], []>} : vector<1x64xf32>, vector<64x128xf32>, vector<1x128xf32> -> vector<1x128xf32>
    %228 = arith.addf %227, %3 : vector<1x128xf32>
    %229 = arith.negf %228 : vector<1x128xf32>
    %230 = math.exp %229 : vector<1x128xf32>
    %cst_50 = arith.constant 1.000000e+00 : f32
    %231 = vector.broadcast %cst_50 : f32 to vector<1x128xf32>
    %232 = arith.addf %231, %230 : vector<1x128xf32>
    %233 = arith.divf %231, %232 : vector<1x128xf32>
    %234 = math.tanh %228 : vector<1x128xf32>
    %235 = vector.extract_strided_slice %233 {offsets = [0, 0], sizes = [1, 32], strides = [1, 1]} : vector<1x128xf32> to vector<1x32xf32>
    %236 = vector.extract_strided_slice %233 {offsets = [0, 32], sizes = [1, 32], strides = [1, 1]} : vector<1x128xf32> to vector<1x32xf32>
    %237 = vector.extract_strided_slice %234 {offsets = [0, 64], sizes = [1, 32], strides = [1, 1]} : vector<1x128xf32> to vector<1x32xf32>
    %238 = vector.extract_strided_slice %233 {offsets = [0, 96], sizes = [1, 32], strides = [1, 1]} : vector<1x128xf32> to vector<1x32xf32>
    %239 = arith.mulf %236, %202 : vector<1x32xf32>
    %240 = arith.mulf %235, %237 : vector<1x32xf32>
    %241 = arith.addf %239, %240 : vector<1x32xf32>
    %242 = math.tanh %241 : vector<1x32xf32>
    %243 = arith.mulf %238, %242 : vector<1x32xf32>
    %244 = arith.index_cast %c5_i32 : i32 to index
    %c0_51 = arith.constant 0 : index
    %245 = vector.load %arg14[%244, %c0_51] : memref<8x32xf32, #tpu.memory_space<vmem>>, vector<1x32xf32>
    tpu.vector_store %arg14[%244, %c0_51], %243 {strides = array<i32>} : memref<8x32xf32, #tpu.memory_space<vmem>>, vector<1x32xf32>,
    %c6_i32 = arith.constant 6 : i32
    %246 = arith.index_cast %c6_i32 : i32 to index
    %c0_52 = arith.constant 0 : index
    %247 = vector.load %arg13[%246, %c0_52] : memref<8x128xf32, #tpu.memory_space<vmem>>, vector<1x128xf32>
    %cst_53 = arith.constant dense<0.000000e+00> : vector<1x128xf32>
    %248 = tpu.matmul %225, %1, %cst_53 {dimension_numbers = #tpu.dot_dimension_numbers<[1], [0], [0], [1], [0, 0, 1, 1], [], []>} : vector<1x32xf32>, vector<32x128xf32>, vector<1x128xf32> -> vector<1x128xf32>
    %249 = arith.addf %247, %248 : vector<1x128xf32>
    %250 = arith.negf %249 : vector<1x128xf32>
    %251 = math.exp %250 : vector<1x128xf32>
    %cst_54 = arith.constant 1.000000e+00 : f32
    %252 = vector.broadcast %cst_54 : f32 to vector<1x128xf32>
    %253 = arith.addf %252, %251 : vector<1x128xf32>
    %254 = arith.divf %252, %253 : vector<1x128xf32>
    %255 = math.tanh %249 : vector<1x128xf32>
    %256 = vector.extract_strided_slice %254 {offsets = [0, 0], sizes = [1, 32], strides = [1, 1]} : vector<1x128xf32> to vector<1x32xf32>
    %257 = vector.extract_strided_slice %254 {offsets = [0, 32], sizes = [1, 32], strides = [1, 1]} : vector<1x128xf32> to vector<1x32xf32>
    %258 = vector.extract_strided_slice %255 {offsets = [0, 64], sizes = [1, 32], strides = [1, 1]} : vector<1x128xf32> to vector<1x32xf32>
    %259 = vector.extract_strided_slice %254 {offsets = [0, 96], sizes = [1, 32], strides = [1, 1]} : vector<1x128xf32> to vector<1x32xf32>
    %260 = arith.mulf %257, %223 : vector<1x32xf32>
    %261 = arith.mulf %256, %258 : vector<1x32xf32>
    %262 = arith.addf %260, %261 : vector<1x32xf32>
    %263 = math.tanh %262 : vector<1x32xf32>
    %264 = arith.mulf %259, %263 : vector<1x32xf32>
    %265 = tpu.concatenate %264, %243 in 1 : vector<1x32xf32>, vector<1x32xf32> -> vector<1x64xf32>
    %cst_55 = arith.constant dense<0.000000e+00> : vector<1x128xf32>
    %266 = tpu.matmul %265, %2, %cst_55 {dimension_numbers = #tpu.dot_dimension_numbers<[1], [0], [0], [1], [0, 0, 1, 1], [], []>} : vector<1x64xf32>, vector<64x128xf32>, vector<1x128xf32> -> vector<1x128xf32>
    %267 = arith.addf %266, %3 : vector<1x128xf32>
    %268 = arith.negf %267 : vector<1x128xf32>
    %269 = math.exp %268 : vector<1x128xf32>
    %cst_56 = arith.constant 1.000000e+00 : f32
    %270 = vector.broadcast %cst_56 : f32 to vector<1x128xf32>
    %271 = arith.addf %270, %269 : vector<1x128xf32>
    %272 = arith.divf %270, %271 : vector<1x128xf32>
    %273 = math.tanh %267 : vector<1x128xf32>
    %274 = vector.extract_strided_slice %272 {offsets = [0, 0], sizes = [1, 32], strides = [1, 1]} : vector<1x128xf32> to vector<1x32xf32>
    %275 = vector.extract_strided_slice %272 {offsets = [0, 32], sizes = [1, 32], strides = [1, 1]} : vector<1x128xf32> to vector<1x32xf32>
    %276 = vector.extract_strided_slice %273 {offsets = [0, 64], sizes = [1, 32], strides = [1, 1]} : vector<1x128xf32> to vector<1x32xf32>
    %277 = vector.extract_strided_slice %272 {offsets = [0, 96], sizes = [1, 32], strides = [1, 1]} : vector<1x128xf32> to vector<1x32xf32>
    %278 = arith.mulf %275, %241 : vector<1x32xf32>
    %279 = arith.mulf %274, %276 : vector<1x32xf32>
    %280 = arith.addf %278, %279 : vector<1x32xf32>
    %281 = math.tanh %280 : vector<1x32xf32>
    %282 = arith.mulf %277, %281 : vector<1x32xf32>
    %283 = arith.index_cast %c6_i32 : i32 to index
    %c0_57 = arith.constant 0 : index
    %284 = vector.load %arg14[%283, %c0_57] : memref<8x32xf32, #tpu.memory_space<vmem>>, vector<1x32xf32>
    tpu.vector_store %arg14[%283, %c0_57], %282 {strides = array<i32>} : memref<8x32xf32, #tpu.memory_space<vmem>>, vector<1x32xf32>,
    %c7_i32 = arith.constant 7 : i32
    %285 = arith.index_cast %c7_i32 : i32 to index
    %c0_58 = arith.constant 0 : index
    %286 = vector.load %arg13[%285, %c0_58] : memref<8x128xf32, #tpu.memory_space<vmem>>, vector<1x128xf32>
    %cst_59 = arith.constant dense<0.000000e+00> : vector<1x128xf32>
    %287 = tpu.matmul %264, %1, %cst_59 {dimension_numbers = #tpu.dot_dimension_numbers<[1], [0], [0], [1], [0, 0, 1, 1], [], []>} : vector<1x32xf32>, vector<32x128xf32>, vector<1x128xf32> -> vector<1x128xf32>
    %288 = arith.addf %286, %287 : vector<1x128xf32>
    %289 = arith.negf %288 : vector<1x128xf32>
    %290 = math.exp %289 : vector<1x128xf32>
    %cst_60 = arith.constant 1.000000e+00 : f32
    %291 = vector.broadcast %cst_60 : f32 to vector<1x128xf32>
    %292 = arith.addf %291, %290 : vector<1x128xf32>
    %293 = arith.divf %291, %292 : vector<1x128xf32>
    %294 = math.tanh %288 : vector<1x128xf32>
    %295 = vector.extract_strided_slice %293 {offsets = [0, 0], sizes = [1, 32], strides = [1, 1]} : vector<1x128xf32> to vector<1x32xf32>
    %296 = vector.extract_strided_slice %293 {offsets = [0, 32], sizes = [1, 32], strides = [1, 1]} : vector<1x128xf32> to vector<1x32xf32>
    %297 = vector.extract_strided_slice %294 {offsets = [0, 64], sizes = [1, 32], strides = [1, 1]} : vector<1x128xf32> to vector<1x32xf32>
    %298 = vector.extract_strided_slice %293 {offsets = [0, 96], sizes = [1, 32], strides = [1, 1]} : vector<1x128xf32> to vector<1x32xf32>
    %299 = arith.mulf %296, %262 : vector<1x32xf32>
    %300 = arith.mulf %295, %297 : vector<1x32xf32>
    %301 = arith.addf %299, %300 : vector<1x32xf32>
    %302 = math.tanh %301 : vector<1x32xf32>
    %303 = arith.mulf %298, %302 : vector<1x32xf32>
    %304 = tpu.concatenate %303, %282 in 1 : vector<1x32xf32>, vector<1x32xf32> -> vector<1x64xf32>
    %cst_61 = arith.constant dense<0.000000e+00> : vector<1x128xf32>
    %305 = tpu.matmul %304, %2, %cst_61 {dimension_numbers = #tpu.dot_dimension_numbers<[1], [0], [0], [1], [0, 0, 1, 1], [], []>} : vector<1x64xf32>, vector<64x128xf32>, vector<1x128xf32> -> vector<1x128xf32>
    %306 = arith.addf %305, %3 : vector<1x128xf32>
    %307 = arith.negf %306 : vector<1x128xf32>
    %308 = math.exp %307 : vector<1x128xf32>
    %cst_62 = arith.constant 1.000000e+00 : f32
    %309 = vector.broadcast %cst_62 : f32 to vector<1x128xf32>
    %310 = arith.addf %309, %308 : vector<1x128xf32>
    %311 = arith.divf %309, %310 : vector<1x128xf32>
    %312 = math.tanh %306 : vector<1x128xf32>
    %313 = vector.extract_strided_slice %311 {offsets = [0, 0], sizes = [1, 32], strides = [1, 1]} : vector<1x128xf32> to vector<1x32xf32>
    %314 = vector.extract_strided_slice %311 {offsets = [0, 32], sizes = [1, 32], strides = [1, 1]} : vector<1x128xf32> to vector<1x32xf32>
    %315 = vector.extract_strided_slice %312 {offsets = [0, 64], sizes = [1, 32], strides = [1, 1]} : vector<1x128xf32> to vector<1x32xf32>
    %316 = vector.extract_strided_slice %311 {offsets = [0, 96], sizes = [1, 32], strides = [1, 1]} : vector<1x128xf32> to vector<1x32xf32>
    %317 = arith.mulf %314, %280 : vector<1x32xf32>
    %318 = arith.mulf %313, %315 : vector<1x32xf32>
    %319 = arith.addf %317, %318 : vector<1x32xf32>
    %320 = math.tanh %319 : vector<1x32xf32>
    %321 = arith.mulf %316, %320 : vector<1x32xf32>
    %322 = arith.index_cast %c7_i32 : i32 to index
    %c0_63 = arith.constant 0 : index
    %323 = vector.load %arg14[%322, %c0_63] : memref<8x32xf32, #tpu.memory_space<vmem>>, vector<1x32xf32>
    tpu.vector_store %arg14[%322, %c0_63], %321 {strides = array<i32>} : memref<8x32xf32, #tpu.memory_space<vmem>>, vector<1x32xf32>,
    %c8_i32 = arith.constant 8 : i32
    %c0_64 = arith.constant 0 : index
    %c0_65 = arith.constant 0 : index
    %324 = vector.load %arg14[%c0_64, %c0_65] : memref<8x32xf32, #tpu.memory_space<vmem>>, vector<8x32xf32>
    %c0_66 = arith.constant 0 : index
    %c0_67 = arith.constant 0 : index
    %325 = vector.load %arg7[%c0_66, %c0_67] : memref<32x24xf32, #tpu.memory_space<vmem>>, vector<32x24xf32>
    %cst_68 = arith.constant dense<0.000000e+00> : vector<8x24xf32>
    %326 = tpu.matmul %324, %325, %cst_68 {dimension_numbers = #tpu.dot_dimension_numbers<[1], [0], [0], [1], [0, 0, 1, 1], [], []>} : vector<8x32xf32>, vector<32x24xf32>, vector<8x24xf32> -> vector<8x24xf32>
    %c0_69 = arith.constant 0 : index
    %c0_70 = arith.constant 0 : index
    %327 = vector.load %arg8[%c0_69, %c0_70] : memref<1x24xf32, #tpu.memory_space<vmem>>, vector<1x24xf32>
    %328 = vector.broadcast %327 : vector<1x24xf32> to vector<8x24xf32>
    %329 = arith.addf %326, %328 : vector<8x24xf32>
    %c0_71 = arith.constant 0 : index
    %c0_72 = arith.constant 0 : index
    %330 = vector.load %arg9[%c0_71, %c0_72] : memref<6x24xf32, #tpu.memory_space<vmem>>, vector<6x24xf32>
    %cst_73 = arith.constant dense<0.000000e+00> : vector<8x24xf32>
    %331 = tpu.matmul %0, %330, %cst_73 {dimension_numbers = #tpu.dot_dimension_numbers<[1], [0], [0], [1], [0, 0, 1, 1], [], []>} : vector<8x6xf32>, vector<6x24xf32>, vector<8x24xf32> -> vector<8x24xf32>
    %332 = arith.mulf %329, %331 : vector<8x24xf32>
    %c0_74 = arith.constant 0 : index
    %c0_75 = arith.constant 0 : index
    %333 = vector.load %arg10[%c0_74, %c0_75] : memref<24x4xf32, #tpu.memory_space<vmem>>, vector<24x4xf32>
    %cst_76 = arith.constant dense<0.000000e+00> : vector<8x4xf32>
    %334 = tpu.matmul %332, %333, %cst_76 {dimension_numbers = #tpu.dot_dimension_numbers<[1], [0], [0], [1], [0, 0, 1, 1], [], []>} : vector<8x24xf32>, vector<24x4xf32>, vector<8x4xf32> -> vector<8x4xf32>
    %335 = vector.extract_strided_slice %0 {offsets = [0, 0], sizes = [8, 4], strides = [1, 1]} : vector<8x6xf32> to vector<8x4xf32>
    %336 = vector.broadcast %4 : f32 to vector<8x4xf32>
    %337 = arith.mulf %334, %336 : vector<8x4xf32>
    %338 = arith.addf %335, %337 : vector<8x4xf32>
    %c0_77 = arith.constant 0 : index
    %c0_78 = arith.constant 0 : index
    %339 = vector.load %arg12[%c0_77, %c0_78] : memref<8x4xf32, #tpu.memory_space<vmem>>, vector<8x4xf32>
    tpu.vector_store %arg12[%c0_77, %c0_78], %338 {strides = array<i32>} : memref<8x4xf32, #tpu.memory_space<vmem>>, vector<8x4xf32>,
    return
  }
  func.func @transform_0(%arg0: i32) -> (i32, i32) {
    %c0_i32 = arith.constant 0 : i32
    %c0_i32_0 = arith.constant 0 : i32
    %c0_i32_1 = arith.constant 0 : i32
    return %c0_i32, %c0_i32_0 : i32, i32
  }
  func.func @transform_1(%arg0: i32) -> (i32, i32) {
    %c0_i32 = arith.constant 0 : i32
    %c0_i32_0 = arith.constant 0 : i32
    %c0_i32_1 = arith.constant 0 : i32
    return %c0_i32, %c0_i32_0 : i32, i32
  }
  func.func @transform_2(%arg0: i32) -> (i32, i32) {
    %c0_i32 = arith.constant 0 : i32
    %c0_i32_0 = arith.constant 0 : i32
    %c0_i32_1 = arith.constant 0 : i32
    return %c0_i32, %c0_i32_0 : i32, i32
  }
  func.func @transform_3(%arg0: i32) -> (i32, i32) {
    %c0_i32 = arith.constant 0 : i32
    %c0_i32_0 = arith.constant 0 : i32
    %c0_i32_1 = arith.constant 0 : i32
    return %c0_i32, %c0_i32_0 : i32, i32
  }
  func.func @transform_4(%arg0: i32) -> (i32, i32) {
    %c0_i32 = arith.constant 0 : i32
    %c0_i32_0 = arith.constant 0 : i32
    %c0_i32_1 = arith.constant 0 : i32
    return %c0_i32, %c0_i32_0 : i32, i32
  }
  func.func @transform_5(%arg0: i32) -> (i32, i32) {
    %c0_i32 = arith.constant 0 : i32
    %c0_i32_0 = arith.constant 0 : i32
    %c0_i32_1 = arith.constant 0 : i32
    return %c0_i32, %c0_i32_0 : i32, i32
  }
  func.func @transform_6(%arg0: i32) -> (i32, i32) {
    %c0_i32 = arith.constant 0 : i32
    %c0_i32_0 = arith.constant 0 : i32
    %c0_i32_1 = arith.constant 0 : i32
    return %c0_i32, %c0_i32_0 : i32, i32
  }
  func.func @transform_7(%arg0: i32) -> (i32, i32) {
    %c0_i32 = arith.constant 0 : i32
    %c0_i32_0 = arith.constant 0 : i32
    %c0_i32_1 = arith.constant 0 : i32
    return %c0_i32, %c0_i32_0 : i32, i32
  }
  func.func @transform_8(%arg0: i32) -> (i32, i32) {
    %c0_i32 = arith.constant 0 : i32
    %c0_i32_0 = arith.constant 0 : i32
    %c0_i32_1 = arith.constant 0 : i32
    return %c0_i32, %c0_i32_0 : i32, i32
  }
  func.func @transform_9(%arg0: i32) -> (i32, i32) {
    %c0_i32 = arith.constant 0 : i32
    %c0_i32_0 = arith.constant 0 : i32
    %c0_i32_1 = arith.constant 0 : i32
    return %c0_i32, %c0_i32_0 : i32, i32
  }
  func.func @transform_10(%arg0: i32) -> (i32, i32) {
    %c0_i32 = arith.constant 0 : i32
    %c0_i32_0 = arith.constant 0 : i32
    %c0_i32_1 = arith.constant 0 : i32
    return %c0_i32, %c0_i32_0 : i32, i32
  }
  func.func @transform_11(%arg0: i32) -> (i32, i32) {
    %c0_i32 = arith.constant 0 : i32
    %c0_i32_0 = arith.constant 0 : i32
    %c0_i32_1 = arith.constant 0 : i32
    return %c0_i32, %c0_i32_0 : i32, i32
  }
}

</mosaic_0001>

<bundles_post_ra>
// kernel: tpu_custom_call.1
= control target key start
LH: loop header
LB: loop body
LE: loop exit
PB: predicated region body
PF: predicated region fallthrough
CT: control target
= control target key end

     0   :  { %17 = vsyncpa [#allocation6], 0  ;;  %s2171_s0 = inlined_call_operand.hbm [shape: f32[8,6], index: 0, kind: input, shape index: {}]   ;;  %s2172_s1 = inlined_call_operand.hbm [shape: f32[6,128], index: 1, kind: input, shape index: {}]   ;;  %s2173_s2 = inlined_call_operand.hbm [shape: f32[32,128], index: 2, kind: input, shape index: {}]   ;;  %s2174_s3 = inlined_call_operand.hbm [shape: f32[1,128], index: 3, kind: input, shape index: {}]   ;;  %s2175_s4 = inlined_call_operand.vmem [shape: f32[64,128], index: 4, kind: input, shape index: {}]   ;;  %s2176_s5 = inlined_call_operand.hbm [shape: f32[1,128], index: 5, kind: input, shape index: {}]   ;;  %s2177_s6 = inlined_call_operand.vmem [shape: f32[32,24], index: 6, kind: input, shape index: {}]   ;;  %s2178_s7 = inlined_call_operand.hbm [shape: f32[1,24], index: 7, kind: input, shape index: {}]   ;;  %s2179_s8 = inlined_call_operand.hbm [shape: f32[6,24], index: 8, kind: input, shape index: {}]   ;;  %s2180_s9 = inlined_call_operand.vmem [shape: f32[24,4], index: 9, kind: input, shape index: {}]   ;;  %s2181_s10 = inlined_call_operand.<no memory space> [shape: f32[1,1], index: 10, kind: input, shape index: {}]   ;;  %s2182_s11 = inlined_call_operand.vmem [shape: f32[8,4], index: 11, kind: output, shape index: {}]  }
   0x1   :  { %18 = vsyncpa [#allocation8], 0 }
   0x2   :  { %19 = vsyncpa [#allocation11], 0  ;;  %s37_s19 = sshll.u32 %s2172_s1, 4  ;;  %s38_s19 = int_to_ptr.hbm [resolvable:$true] %s37_s19 }
   0x3   :  { %20 = vsyncpa [#allocation14], 0  ;;  %s1712_s20 = smov [#allocation7]   ;;  %s61_s24 = sshll.u32 %s2174_s3, 4  ;;  %s62_s24 = int_to_ptr.hbm [resolvable:$true] %s61_s24 }
   0x4   :  { %s39_s21 = sshll.u32 %s1712_s20, 4  ;;  %s1713_s25 = smov [#allocation10]   ;;  %s40_s21 = int_to_ptr.vmem [resolvable:$true] %s39_s21 }
   0x5   :  { %42 = dma.hbm_to_vmem [thread:$0]  %s38_s19, 128, %s40_s21, [#allocation8]  }
   0x6   :  { %s63_s26 = sshll.u32 %s1713_s25, 4  ;;  %s87_s29 = sshll.u32 %s2178_s7, 4  ;;  %s64_s26 = int_to_ptr.vmem [resolvable:$true] %s63_s26  ;;  %s88_s29 = int_to_ptr.hbm [resolvable:$true] %s87_s29 }
   0x7   :  { %66 = dma.hbm_to_vmem [thread:$0]  %s62_s24, 16, %s64_s26, [#allocation11]  }
   0x8   :  { %s26_s12 = sshll.u32 %s2171_s0, 4  ;;  %s1714_s13 = smov [#allocation13]   ;;  %s27_s12 = int_to_ptr.hbm [resolvable:$true] %s26_s12 }
   0x9   :  { %s89_s14 = sshll.u32 %s1714_s13, 4  ;;  %s1715_s3 = smov [#allocation5]   ;;  %s90_s14 = int_to_ptr.vmem [resolvable:$true] %s89_s14 }
   0xa   :  { %92 = dma.hbm_to_vmem [thread:$0]  %s88_s29, 16, %s90_s14, [#allocation14]  }
   0xb   :  { %s28_s15 = sshll.u32 %s1715_s3, 4  ;;  %s47_s18 = sshll.u32 %s2173_s2, 4  ;;  %s29_s15 = int_to_ptr.vmem [resolvable:$true] %s28_s15  ;;  %s48_s18 = int_to_ptr.hbm [resolvable:$true] %s47_s18 }
   0xc   :  { %31 = dma.hbm_to_vmem [thread:$0]  %s27_s12, 128, %s29_s15, [#allocation6]  }
   0xd   :  { %s1716_s7 = smov [#allocation9]   ;;  %s74_s0 = sshll.u32 %s2176_s5, 4  ;;  %s75_s0 = int_to_ptr.hbm [resolvable:$true] %s74_s0 }
   0xe   :  { %s49_s19 = sshll.u32 %s1716_s7, 4  ;;  %s1717_s22 = smov 128   ;;  %s50_s19 = int_to_ptr.vmem [resolvable:$true] %s49_s19 }
   0xf   :  { %s1718_s23 = smov 8   ;;  %s1719_s24 = smov [#allocation12]  }
  0x10   :  { %55 = dma.hbm_to_vmem [thread:$0]  %s48_s18, 512, %s50_s19, [#allocation8], %s1717_s22, %s1717_s22, %s1718_s23  }
  0x11   :  { %s76_s25 = sshll.u32 %s1719_s24, 4  ;;  %s98_s2 = sshll.u32 %s2179_s8, 4  ;;  %s77_s25 = int_to_ptr.vmem [resolvable:$true] %s76_s25  ;;  %s99_s2 = int_to_ptr.hbm [resolvable:$true] %s98_s2 }
  0x12   :  { %79 = dma.hbm_to_vmem [thread:$0]  %s75_s0, 16, %s77_s25, [#allocation11]  }
  0x13   :  { %s1720_s28 = smov [#allocation15]  }
  0x14   :  { %s100_s29 = sshll.u32 %s1720_s28, 4  ;;  %s101_s29 = int_to_ptr.vmem [resolvable:$true] %s100_s29 }
  0x15   :  { %103 = dma.hbm_to_vmem [thread:$0]  %s99_s2, 128, %s101_s29, [#allocation14]  }
  0x16   :  { %1704 = dma.done.wait [#allocation6], 128  }
  0x17   :  { %1705 = vsyncadd [#allocation6], 4294967168 }
  0x18   :  { %1706 = dma.done.wait [#allocation8], 640  }
  0x19   :  { %1707 = vsyncadd [#allocation8], 4294966656 }
  0x1a   :  { %1708 = dma.done.wait [#allocation11], 32  }
  0x1b   :  { %1709 = vsyncadd [#allocation11], 4294967264 }
  0x1c   :  { %1710 = dma.done.wait [#allocation14], 144  }
  0x1d   :  { %1711 = vsyncadd [#allocation14], 4294967152  ;;  %vm160_vm0 = vcmask 1045504   ;;  %vm156_vm1 = vcmask 48128   ;;  %v151_v0 = vld [vmem:[#allocation7] sm:$0x3f] }
  0x1e   :  { %v136_v1 = vld [vmem:[#allocation5] sm:$0xff]  ;;  %v1805_v2 = vld [vmem:[#allocation9 + $0x18] sm:$0xff]  ;;  %1355 = vmatpush.msk.msra.mxu0 %vm160_vm0, %v151_v0  ;;  %v1812_v4 = vld [vmem:[#allocation9 + $0x8] sm:$0xff]  ;;  %v1721_v6 = vmov 0.0   ;;  %s1722_s5 = smov 64   ;;  %s1723_s8 = smov 32  }
  0x1f   :  { %202 = vmatpush.msra.mxu1 %v1805_v2  ;;  %v1809_v3 = vld [vmem:[#allocation9 + $0x10] sm:$0xff]  ;;  %1356 = vmatmul.msk.f32.vlgmr.msra.gmra.mxu0 %vm156_vm1, %v136_v1  ;;  %v1816_v5 = vld [vmem:[#allocation9] sm:$0xff]  ;;  %v1840_v33 = vld [vmem:[%s2175_s4 + $0x38] sm:$0xff]  ;;  %vm186_vm6 = vcmask 261120   ;;  %vm253_vm7 = vcmask 523264  }
  0x20   :  { %335 = vmatpush.msra.mxu3 %v1805_v2  ;;  %v1404_v7 = vld [vmem:[#allocation10] ss:$0 sm:$0xff]  ;;  %v1845_v34 = vld [vmem:[%s2175_s4 + $0x30] sm:$0xff]  ;;  %265 = vmatpush.msra.mxu2 %v1840_v33  ;;  %v1852_v35 = vld [vmem:[%s2175_s4 + $0x28] sm:$0xff] }
  0x21   :  { %203 = vmatpush.msra.mxu1 %v1809_v3  ;;  %400 = vmatpush.msrb.mxu0 %v1840_v33  ;;  %v1860_v36 = vld [vmem:[%s2175_s4 + $0x20] sm:$0xff]  ;;  %v1868_v37 = vld [vmem:[%s2175_s4 + $0x18] sm:$0xff]  ;;  %v1876_v38 = vld [vmem:[%s2175_s4 + $0x10] sm:$0xff] }
  0x22   :  { %336 = vmatpush.msra.mxu3 %v1809_v3  ;;  %266 = vmatpush.msra.mxu2 %v1845_v34  ;;  %v1884_v39 = vld [vmem:[%s2175_s4 + $0x8] sm:$0xff]  ;;  %v1897_v42 = vld [vmem:[%s2175_s4] sm:$0xff] }
  0x23   :  { %204 = vmatpush.msra.mxu1 %v1812_v4  ;;  %401 = vmatpush.msrb.mxu0 %v1845_v34  ;;  %v1925_v45 = vld [vmem:[#allocation12] sm:$0x1] }
  0x24   :  { %337 = vmatpush.msra.mxu3 %v1812_v4  ;;  %267 = vmatpush.msra.mxu2 %v1852_v35 }
  0x25   :  { %205 = vmatpush.msra.mxu1 %v1816_v5  ;;  %402 = vmatpush.msrb.mxu0 %v1852_v35 }
  0x26   :  { %206 = vmatmul.f32.vlgmr.msra.gmra.mxu1 %v1721_v6  ;;  %338 = vmatpush.msra.mxu3 %v1816_v5 }
  0x27   :  { %469 = vmatpush.msrb.mxu1 %v1805_v2  ;;  %268 = vmatpush.msra.mxu2 %v1860_v36 }
  0x28   :  { %534 = vmatpush.msrb.mxu3 %v1840_v33  ;;  %403 = vmatpush.msrb.mxu0 %v1860_v36 }
  0x29   :  { %470 = vmatpush.msrb.mxu1 %v1809_v3  ;;  %269 = vmatpush.msra.mxu2 %v1868_v37 }
  0x2a   :  { %535 = vmatpush.msrb.mxu3 %v1845_v34  ;;  %404 = vmatpush.msrb.mxu0 %v1868_v37 }
  0x2b   :  { %471 = vmatpush.msrb.mxu1 %v1812_v4  ;;  %270 = vmatpush.msra.mxu2 %v1876_v38 }
  0x2c   :  { %536 = vmatpush.msrb.mxu3 %v1852_v35  ;;  %405 = vmatpush.msrb.mxu0 %v1876_v38 }
  0x2d   :  { %472 = vmatpush.msrb.mxu1 %v1816_v5  ;;  %271 = vmatpush.msra.mxu2 %v1884_v39 }
  0x2e   :  { %537 = vmatpush.msrb.mxu3 %v1860_v36  ;;  %406 = vmatpush.msrb.mxu0 %v1884_v39 }
  0x2f   :  { %603 = vmatpush.msra.mxu1 %v1805_v2  ;;  %272 = vmatpush.msra.mxu2 %v1897_v42 }
  0x30   :  { %538 = vmatpush.msrb.mxu3 %v1868_v37  ;;  %407 = vmatpush.msrb.mxu0 %v1897_v42 }
  0x31   :  { %604 = vmatpush.msra.mxu1 %v1809_v3  ;;  %668 = vmatpush.msrb.mxu2 %v1840_v33 }
  0x32   :  { %539 = vmatpush.msrb.mxu3 %v1876_v38  ;;  %737 = vmatpush.msra.mxu0 %v1805_v2 }
  0x33   :  { %605 = vmatpush.msra.mxu1 %v1812_v4  ;;  %669 = vmatpush.msrb.mxu2 %v1845_v34 }
  0x34   :  { %540 = vmatpush.msrb.mxu3 %v1884_v39  ;;  %738 = vmatpush.msra.mxu0 %v1809_v3 }
  0x35   :  { %606 = vmatpush.msra.mxu1 %v1816_v5  ;;  %670 = vmatpush.msrb.mxu2 %v1852_v35 }
  0x36   :  { %541 = vmatpush.msrb.mxu3 %v1897_v42  ;;  %739 = vmatpush.msra.mxu0 %v1812_v4 }
  0x37   :  { %671 = vmatpush.msrb.mxu2 %v1860_v36 }
  0x38   :  { %740 = vmatpush.msra.mxu0 %v1816_v5 }
  0x39   :  { %672 = vmatpush.msrb.mxu2 %v1868_v37 }
  0x3b   :  { %673 = vmatpush.msrb.mxu2 %v1876_v38 }
  0x3d   :  { %674 = vmatpush.msrb.mxu2 %v1884_v39 }
  0x3f   :  { %675 = vmatpush.msrb.mxu2 %v1897_v42 }
  0x9c   :  { %v181_v8 = vpop.f32.mrf.mxu0 }
  0x9d   :  { %v182_v9 = vadd.f32 %v1404_v7, %v181_v8 }
  0x9f   :  { %184 = vst [vmem:[#allocation2] sm:$0xff] %v182_v9 }
  0xa3   :  { %v207_v10 = vpop.f32.mrf.mxu1 }
  0xa6   :  { %v185_v11 = vld [vmem:[#allocation2] sm:$0x1]  ;;  %v320_v49 = vld [vmem:[#allocation2 + $0x1] sm:$0x1] }
  0xa7   :  { %v210_v12 = vadd.f32 %v207_v10, %v185_v11 }
  0xa9   :  { %1406 = vtanh.f32 %v210_v12  ;;  %v1357_v14 = vmul.f32 -1.442695, %v210_v12 }
  0xab   :  { %1408 = vpow2.f32 %v1357_v14 }
  0xaf   :  { %v1407_v13 = vpop.eup %1406 }
  0xb0   :  { %233 = vrot.lane.b32.xlu0 %v1407_v13, %s1722_s5 }
  0xb1   :  { %v1409_v15 = vpop.eup %1408 }
  0xb2   :  { %v214_v16 = vadd.f32 1.0, %v1409_v15 }
  0xb4   :  { %1410 = vrcp.f32 %v214_v16  ;;  %v226_v22 = vand.u32 2147483648, %v214_v16  ;;  %vm220_vm3 = vweird.f32 %v214_v16  ;;  %v224_v23 = vand.u32 2147483647, %v214_v16 }
  0xb6   :  { %v227_v25 = vor.u32 1.1754944e-38, %v226_v22  ;;  %vm225_vm5 = vcmp.eq.f32.partialorder %v224_v23, 8.507059e+37 }
  0xba   :  { %v1411_v17 = vpop.eup %1410 }
  0xbb   :  { %v216_v18 = vmul.f32 %v1411_v17, %v214_v16  ;;  %vm221_vm2 = vweird.f32 %v1411_v17 }
  0xbc   :  { %vm222_vm4 = vmor %vm220_vm3, %vm221_vm2 }
  0xbd   :  { %v217_v19 = vsub.f32 1.0, %v216_v18 }
  0xbf   :  { %v218_v20 = vmul.f32 %v1411_v17, %v217_v19 }
  0xc1   :  { %v219_v21 = vadd.f32 %v1411_v17, %v218_v20 }
  0xc3   :  { %v223_v24 = vsel %vm222_vm4, %v1411_v17, %v219_v21 }
  0xc4   :  { %v228_v27 = vsel %vm225_vm5, %v227_v25, %v223_v24 }
  0xc5   :  { %v231_v29 = vmul.f32 0.0, %v228_v27 }
 0x122   :  { %v234_v26 = vpop.permute.xlu0 %233 }
 0x123   :  { %v236_v28 = vmul.f32 %v234_v26, %v228_v27 }
 0x125   :  { %238 = vrot.lane.b32.xlu0 %v236_v28, %s1723_s8 }
 0x197   :  { %v239_v30 = vpop.permute.xlu0 %238 }
 0x198   :  { %v1833_v31 = vadd.f32 %v239_v30, %v231_v29 }
 0x19a   :  { %1412 = vtanh.f32 %v1833_v31 }
 0x1a0   :  { %v1413_v32 = vpop.eup %1412 }
 0x1a1   :  { %244 = vrot.lane.b32.xlu1 %v1413_v32, %s1722_s5 }
 0x213   :  { %v245_v40 = vpop.permute.xlu1 %244 }
 0x214   :  { %v247_v41 = vmul.f32 %v245_v40, %v228_v27 }
 0x216   :  { %249 = vrot.lane.b32.xlu1 %v247_v41, %s1723_s8 }
 0x288   :  { %v250_v43 = vpop.permute.xlu1 %249 }
 0x289   :  { %1360 = vmatmul.msk.f32.vlgmr.msra.gmra.mxu3 %vm186_vm6, %v250_v43  ;;  %v252_v44 = vsel %vm186_vm6, %v250_v43, 0.0 }
 0x28a   :  { %1358 = vmatmul.msk.f32.vlgmr.msra.gmra.mxu2 %vm253_vm7, %v252_v44  ;;  %871 = vmatpush.msra.mxu3 %v1805_v2 }
 0x28b   :  { %1005 = vmatpush.msra.mxu2 %v1805_v2 }
 0x28c   :  { %872 = vmatpush.msra.mxu3 %v1809_v3 }
 0x28d   :  { %1006 = vmatpush.msra.mxu2 %v1809_v3 }
 0x28e   :  { %873 = vmatpush.msra.mxu3 %v1812_v4 }
 0x28f   :  { %1007 = vmatpush.msra.mxu2 %v1812_v4 }
 0x290   :  { %874 = vmatpush.msra.mxu3 %v1816_v5 }
 0x291   :  { %1008 = vmatpush.msra.mxu2 %v1816_v5 }
 0x30c   :  { %v340_v48 = vpop.f32.mrf.mxu3 }
 0x30d   :  { %v274_v46 = vpop.f32.mrf.mxu2  ;;  %v343_v50 = vadd.f32 %v340_v48, %v320_v49 }
 0x30e   :  { %v275_v47 = vadd.f32 %v274_v46, %v1925_v45 }
 0x30f   :  { %v1361_v54 = vmul.f32 -1.442695, %v343_v50 }
 0x310   :  { %1414 = vtanh.f32 %v275_v47  ;;  %v1359_v53 = vmul.f32 -1.442695, %v275_v47  ;;  %v454_v47 = vld [vmem:[#allocation2 + $0x2] sm:$0x1] }
 0x311   :  { %1416 = vtanh.f32 %v343_v50 }
 0x312   :  { %1418 = vpow2.f32 %v1359_v53 }
 0x313   :  { %1420 = vpow2.f32 %v1361_v54 }
 0x316   :  { %v1415_v51 = vpop.eup %1414 }
 0x317   :  { %299 = vrot.lane.b32.xlu2 %v1415_v51, %s1722_s5  ;;  %v1417_v52 = vpop.eup %1416 }
 0x318   :  { %v1419_v55 = vpop.eup %1418 }
 0x319   :  { %v280_v56 = vadd.f32 1.0, %v1419_v55  ;;  %v1421_v57 = vpop.eup %1420 }
 0x31a   :  { %v347_v58 = vadd.f32 1.0, %v1421_v57 }
 0x31b   :  { %1422 = vrcp.f32 %v280_v56  ;;  %v292_v7 = vand.u32 2147483648, %v280_v56  ;;  %vm286_vm9 = vweird.f32 %v280_v56  ;;  %v290_v8 = vand.u32 2147483647, %v280_v56 }
 0x31c   :  { %1424 = vrcp.f32 %v347_v58  ;;  %v359_v16 = vand.u32 2147483648, %v347_v58  ;;  %vm353_vm13 = vweird.f32 %v347_v58  ;;  %v357_v17 = vand.u32 2147483647, %v347_v58 }
 0x31d   :  { %v293_v11 = vor.u32 1.1754944e-38, %v292_v7  ;;  %vm291_vm11 = vcmp.eq.f32.partialorder %v290_v8, 8.507059e+37 }
 0x31e   :  { %v360_v19 = vor.u32 1.1754944e-38, %v359_v16  ;;  %vm358_vm15 = vcmp.eq.f32.partialorder %v357_v17, 8.507059e+37 }
 0x31f   :  { %366 = vrot.lane.b32.xlu2 %v1417_v52, %s1722_s5 }
 0x321   :  { %v1423_v59 = vpop.eup %1422 }
 0x322   :  { %v282_v60 = vmul.f32 %v1423_v59, %v280_v56  ;;  %v1425_v62 = vpop.eup %1424  ;;  %vm287_vm8 = vweird.f32 %v1423_v59 }
 0x323   :  { %v349_v0 = vmul.f32 %v1425_v62, %v347_v58  ;;  %vm288_vm10 = vmor %vm286_vm9, %vm287_vm8  ;;  %vm354_vm12 = vweird.f32 %v1425_v62 }
 0x324   :  { %v283_v61 = vsub.f32 1.0, %v282_v60  ;;  %vm355_vm14 = vmor %vm353_vm13, %vm354_vm12 }
 0x325   :  { %v350_v6 = vsub.f32 1.0, %v349_v0 }
 0x326   :  { %v284_v63 = vmul.f32 %v1423_v59, %v283_v61 }
 0x327   :  { %v351_v10 = vmul.f32 %v1425_v62, %v350_v6 }
 0x328   :  { %v285_v1 = vadd.f32 %v1423_v59, %v284_v63 }
 0x329   :  { %v352_v15 = vadd.f32 %v1425_v62, %v351_v10 }
 0x32a   :  { %v289_v9 = vsel %vm288_vm10, %v1423_v59, %v285_v1 }
 0x32b   :  { %v294_v13 = vsel %vm291_vm11, %v293_v11, %v289_v9  ;;  %v356_v18 = vsel %vm355_vm14, %v1425_v62, %v352_v15 }
 0x32c   :  { %v361_v20 = vsel %vm358_vm15, %v360_v19, %v356_v18  ;;  %v297_v23 = vmul.f32 0.0, %v294_v13 }
 0x32d   :  { %v364_v26 = vmul.f32 %v361_v20, %v1833_v31 }
 0x371   :  { %v300_v12 = vpop.permute.xlu2 %299 }
 0x372   :  { %v302_v14 = vmul.f32 %v300_v12, %v294_v13 }
 0x374   :  { %304 = vrot.lane.b32.xlu0 %v302_v14, %s1723_s8 }
 0x379   :  { %v367_v21 = vpop.permute.xlu2 %366 }
 0x37a   :  { %v369_v22 = vmul.f32 %v367_v21, %v361_v20 }
 0x37c   :  { %371 = vrot.lane.b32.xlu1 %v369_v22, %s1723_s8 }
 0x3e6   :  { %v305_v24 = vpop.permute.xlu0 %304 }
 0x3e7   :  { %v1932_v25 = vadd.f32 %v305_v24, %v297_v23 }
 0x3e9   :  { %1426 = vtanh.f32 %v1932_v25 }
 0x3ee   :  { %v372_v27 = vpop.permute.xlu1 %371 }
 0x3ef   :  { %v1427_v28 = vpop.eup %1426  ;;  %v1936_v29 = vadd.f32 %v372_v27, %v364_v26 }
 0x3f0   :  { %310 = vrot.lane.b32.xlu2 %v1427_v28, %s1722_s5 }
 0x3f1   :  { %1428 = vtanh.f32 %v1936_v29 }
 0x3f7   :  { %v1429_v30 = vpop.eup %1428 }
 0x3f8   :  { %377 = vrot.lane.b32.xlu0 %v1429_v30, %s1722_s5 }
 0x44a   :  { %v311_v32 = vpop.permute.xlu2 %310 }
 0x44b   :  { %v1941_v40 = vmul.f32 %v311_v32, %v294_v13 }
 0x44d   :  { %385 = vrot.lane.b32.xlu2 %v1941_v40, %s1722_s5 }
 0x46a   :  { %v378_v41 = vpop.permute.xlu0 %377 }
 0x46b   :  { %v380_v43 = vmul.f32 %v378_v41, %v361_v20 }
 0x46d   :  { %382 = vrot.lane.b32.xlu1 %v380_v43, %s1723_s8 }
 0x4a7   :  { %v386_v31 = vpop.permute.xlu2 %385 }
 0x4df   :  { %v383_v44 = vpop.permute.xlu1 %382 }
 0x4e0   :  { %v388_v46 = vsel %vm186_vm6, %v383_v44, %v386_v31  ;;  %1364 = vmatmul.msk.f32.vlgmr.msrb.gmra.mxu1 %vm186_vm6, %v383_v44 }
 0x4e1   :  { %1362 = vmatmul.msk.f32.vlgmr.msrb.gmra.mxu0 %vm253_vm7, %v388_v46  ;;  %802 = vmatpush.msrb.mxu1 %v1840_v33 }
 0x4e2   :  { %936 = vmatpush.msrb.mxu0 %v1840_v33 }
 0x4e3   :  { %803 = vmatpush.msrb.mxu1 %v1845_v34 }
 0x4e4   :  { %937 = vmatpush.msrb.mxu0 %v1845_v34 }
 0x4e5   :  { %804 = vmatpush.msrb.mxu1 %v1852_v35 }
 0x4e6   :  { %938 = vmatpush.msrb.mxu0 %v1852_v35 }
 0x4e7   :  { %805 = vmatpush.msrb.mxu1 %v1860_v36 }
 0x4e8   :  { %939 = vmatpush.msrb.mxu0 %v1860_v36 }
 0x4e9   :  { %806 = vmatpush.msrb.mxu1 %v1868_v37 }
 0x4ea   :  { %940 = vmatpush.msrb.mxu0 %v1868_v37 }
 0x4eb   :  { %807 = vmatpush.msrb.mxu1 %v1876_v38 }
 0x4ec   :  { %941 = vmatpush.msrb.mxu0 %v1876_v38 }
 0x4ed   :  { %808 = vmatpush.msrb.mxu1 %v1884_v39 }
 0x4ee   :  { %942 = vmatpush.msrb.mxu0 %v1884_v39 }
 0x4ef   :  { %809 = vmatpush.msrb.mxu1 %v1897_v42 }
 0x4f0   :  { %943 = vmatpush.msrb.mxu0 %v1897_v42 }
 0x55d   :  { %v474_v48 = vpop.f32.mrf.mxu1 }
 0x55e   :  { %v477_v49 = vadd.f32 %v474_v48, %v454_v47  ;;  %v409_v50 = vpop.f32.mrf.mxu0 }
 0x55f   :  { %v410_v51 = vadd.f32 %v409_v50, %v1925_v45 }
 0x560   :  { %1430 = vtanh.f32 %v477_v49  ;;  %v1365_v54 = vmul.f32 -1.442695, %v477_v49 }
 0x561   :  { %1432 = vtanh.f32 %v410_v51  ;;  %v1363_v55 = vmul.f32 -1.442695, %v410_v51 }
 0x562   :  { %1434 = vpow2.f32 %v1365_v54 }
 0x563   :  { %1436 = vpow2.f32 %v1363_v55 }
 0x566   :  { %v1431_v52 = vpop.eup %1430 }
 0x567   :  { %v1433_v53 = vpop.eup %1432  ;;  %500 = vrot.lane.b32.xlu1 %v1431_v52, %s1722_s5 }
 0x568   :  { %434 = vrot.lane.b32.xlu0 %v1433_v53, %s1722_s5  ;;  %v1435_v56 = vpop.eup %1434 }
 0x569   :  { %v1437_v57 = vpop.eup %1436  ;;  %v481_v58 = vadd.f32 1.0, %v1435_v56 }
 0x56a   :  { %v415_v59 = vadd.f32 1.0, %v1437_v57 }
 0x56b   :  { %1438 = vrcp.f32 %v481_v58  ;;  %v493_v9 = vand.u32 2147483648, %v481_v58  ;;  %vm487_vm4 = vweird.f32 %v481_v58  ;;  %v491_v11 = vand.u32 2147483647, %v481_v58 }
 0x56c   :  { %1440 = vrcp.f32 %v415_v59  ;;  %v427_v12 = vand.u32 2147483648, %v415_v59  ;;  %vm421_vm8 = vweird.f32 %v415_v59  ;;  %v425_v13 = vand.u32 2147483647, %v415_v59 }
 0x56d   :  { %v494_v15 = vor.u32 1.1754944e-38, %v493_v9  ;;  %vm492_vm10 = vcmp.eq.f32.partialorder %v491_v11, 8.507059e+37 }
 0x56e   :  { %v428_v17 = vor.u32 1.1754944e-38, %v427_v12  ;;  %vm426_vm11 = vcmp.eq.f32.partialorder %v425_v13, 8.507059e+37 }
 0x571   :  { %v1439_v60 = vpop.eup %1438 }
 0x572   :  { %v1441_v61 = vpop.eup %1440  ;;  %v483_v62 = vmul.f32 %v1439_v60, %v481_v58  ;;  %vm488_vm2 = vweird.f32 %v1439_v60 }
 0x573   :  { %v417_v63 = vmul.f32 %v1441_v61, %v415_v59  ;;  %vm422_vm3 = vweird.f32 %v1441_v61  ;;  %vm489_vm5 = vmor %vm487_vm4, %vm488_vm2 }
 0x574   :  { %v484_v0 = vsub.f32 1.0, %v483_v62  ;;  %vm423_vm9 = vmor %vm421_vm8, %vm422_vm3 }
 0x575   :  { %v418_v1 = vsub.f32 1.0, %v417_v63 }
 0x576   :  { %v485_v6 = vmul.f32 %v1439_v60, %v484_v0 }
 0x577   :  { %v419_v7 = vmul.f32 %v1441_v61, %v418_v1 }
 0x578   :  { %v486_v8 = vadd.f32 %v1439_v60, %v485_v6 }
 0x579   :  { %v420_v10 = vadd.f32 %v1441_v61, %v419_v7 }
 0x57a   :  { %v490_v14 = vsel %vm489_vm5, %v1439_v60, %v486_v8 }
 0x57b   :  { %v424_v16 = vsel %vm423_vm9, %v1441_v61, %v420_v10  ;;  %v495_v19 = vsel %vm492_vm10, %v494_v15, %v490_v14 }
 0x57c   :  { %v429_v22 = vsel %vm426_vm11, %v428_v17, %v424_v16  ;;  %v498_v30 = vmul.f32 %v495_v19, %v1936_v29 }
 0x57d   :  { %v432_v24 = vmul.f32 %v429_v22, %v1932_v25 }
 0x5d9   :  { %v501_v18 = vpop.permute.xlu1 %500 }
 0x5da   :  { %v503_v20 = vmul.f32 %v501_v18, %v495_v19  ;;  %v435_v21 = vpop.permute.xlu0 %434 }
 0x5db   :  { %v437_v23 = vmul.f32 %v435_v21, %v429_v22 }
 0x5dc   :  { %505 = vrot.lane.b32.xlu0 %v503_v20, %s1723_s8 }
 0x5dd   :  { %439 = vrot.lane.b32.xlu2 %v437_v23, %s1723_s8 }
 0x637   :  { %v440_v26 = vpop.permute.xlu2 %439 }
 0x638   :  { %v1971_v27 = vadd.f32 %v440_v26, %v432_v24 }
 0x63a   :  { %1442 = vtanh.f32 %v1971_v27 }
 0x640   :  { %v1443_v28 = vpop.eup %1442 }
 0x641   :  { %445 = vrot.lane.b32.xlu1 %v1443_v28, %s1722_s5 }
 0x64e   :  { %v506_v32 = vpop.permute.xlu0 %505 }
 0x64f   :  { %v1976_v41 = vadd.f32 %v506_v32, %v498_v30 }
 0x651   :  { %1444 = vtanh.f32 %v1976_v41 }
 0x657   :  { %v1445_v43 = vpop.eup %1444 }
 0x658   :  { %511 = vrot.lane.b32.xlu2 %v1445_v43, %s1722_s5 }
 0x6b2   :  { %v512_v31 = vpop.permute.xlu2 %511 }
 0x6b3   :  { %v514_v25 = vmul.f32 %v512_v31, %v495_v19  ;;  %v446_v44 = vpop.permute.xlu1 %445 }
 0x6b4   :  { %v1980_v46 = vmul.f32 %v446_v44, %v429_v22 }
 0x6b5   :  { %516 = vrot.lane.b32.xlu0 %v514_v25, %s1723_s8 }
 0x6b6   :  { %519 = vrot.lane.b32.xlu1 %v1980_v46, %s1722_s5 }
 0x727   :  { %v517_v47 = vpop.permute.xlu0 %516 }
 0x728   :  { %1368 = vmatmul.msk.f32.vlgmr.msra.gmra.mxu1 %vm186_vm6, %v517_v47  ;;  %v520_v29 = vpop.permute.xlu1 %519 }
 0x729   :  { %v522_v48 = vsel %vm186_vm6, %v517_v47, %v520_v29  ;;  %1139 = vmatpush.msra.mxu1 %v1805_v2  ;;  %v588_v2 = vld [vmem:[#allocation2 + $0x3] sm:$0x1] }
 0x72a   :  { %1366 = vmatmul.msk.f32.vlgmr.msrb.gmra.mxu3 %vm253_vm7, %v522_v48  ;;  %v722_v48 = vld [vmem:[#allocation2 + $0x4] sm:$0x1] }
 0x72b   :  { %1140 = vmatpush.msra.mxu1 %v1809_v3  ;;  %1070 = vmatpush.msrb.mxu3 %v1840_v33 }
 0x72d   :  { %1141 = vmatpush.msra.mxu1 %v1812_v4  ;;  %1071 = vmatpush.msrb.mxu3 %v1845_v34 }
 0x72f   :  { %1142 = vmatpush.msra.mxu1 %v1816_v5  ;;  %1072 = vmatpush.msrb.mxu3 %v1852_v35 }
 0x731   :  { %1073 = vmatpush.msrb.mxu3 %v1860_v36 }
 0x733   :  { %1074 = vmatpush.msrb.mxu3 %v1868_v37 }
 0x735   :  { %1075 = vmatpush.msrb.mxu3 %v1876_v38 }
 0x737   :  { %1076 = vmatpush.msrb.mxu3 %v1884_v39 }
 0x739   :  { %1077 = vmatpush.msrb.mxu3 %v1897_v42 }
 0x7a5   :  { %v608_v3 = vpop.f32.mrf.mxu1 }
 0x7a6   :  { %v611_v49 = vadd.f32 %v608_v3, %v588_v2 }
 0x7a8   :  { %1446 = vtanh.f32 %v611_v49  ;;  %v1369_v52 = vmul.f32 -1.442695, %v611_v49 }
 0x7ad   :  { %v543_v4 = vpop.f32.mrf.mxu3 }
 0x7ae   :  { %v1447_v50 = vpop.eup %1446  ;;  %v544_v5 = vadd.f32 %v543_v4, %v1925_v45 }
 0x7af   :  { %634 = vrot.lane.b32.xlu2 %v1447_v50, %s1722_s5 }
 0x7b0   :  { %1448 = vtanh.f32 %v544_v5  ;;  %v1367_v58 = vmul.f32 -1.442695, %v544_v5 }
 0x7b1   :  { %1450 = vpow2.f32 %v1369_v52 }
 0x7b6   :  { %v1449_v51 = vpop.eup %1448 }
 0x7b7   :  { %568 = vrot.lane.b32.xlu0 %v1449_v51, %s1722_s5  ;;  %v1451_v53 = vpop.eup %1450 }
 0x7b8   :  { %v615_v54 = vadd.f32 1.0, %v1451_v53 }
 0x7ba   :  { %1452 = vrcp.f32 %v615_v54  ;;  %v627_v61 = vand.u32 2147483648, %v615_v54  ;;  %vm621_vm13 = vweird.f32 %v615_v54  ;;  %v625_v62 = vand.u32 2147483647, %v615_v54 }
 0x7bb   :  { %1454 = vpow2.f32 %v1367_v58 }
 0x7bc   :  { %v628_v1 = vor.u32 1.1754944e-38, %v627_v61  ;;  %vm626_vm15 = vcmp.eq.f32.partialorder %v625_v62, 8.507059e+37 }
 0x7c0   :  { %v1453_v55 = vpop.eup %1452 }
 0x7c1   :  { %v617_v56 = vmul.f32 %v1453_v55, %v615_v54  ;;  %vm622_vm12 = vweird.f32 %v1453_v55  ;;  %v1455_v63 = vpop.eup %1454 }
 0x7c2   :  { %vm623_vm14 = vmor %vm621_vm13, %vm622_vm12  ;;  %v549_v6 = vadd.f32 1.0, %v1455_v63 }
 0x7c3   :  { %v618_v57 = vsub.f32 1.0, %v617_v56 }
 0x7c4   :  { %1456 = vrcp.f32 %v549_v6  ;;  %v561_v15 = vand.u32 2147483648, %v549_v6  ;;  %vm555_vm3 = vweird.f32 %v549_v6  ;;  %v559_v16 = vand.u32 2147483647, %v549_v6 }
 0x7c5   :  { %v619_v59 = vmul.f32 %v1453_v55, %v618_v57 }
 0x7c6   :  { %v562_v18 = vor.u32 1.1754944e-38, %v561_v15  ;;  %vm560_vm5 = vcmp.eq.f32.partialorder %v559_v16, 8.507059e+37 }
 0x7c7   :  { %v620_v60 = vadd.f32 %v1453_v55, %v619_v59 }
 0x7c9   :  { %v624_v0 = vsel %vm623_vm14, %v1453_v55, %v620_v60 }
 0x7ca   :  { %v629_v8 = vsel %vm626_vm15, %v628_v1, %v624_v0  ;;  %v1457_v10 = vpop.eup %1456 }
 0x7cb   :  { %v551_v11 = vmul.f32 %v1457_v10, %v549_v6  ;;  %vm556_vm2 = vweird.f32 %v1457_v10  ;;  %v632_v22 = vmul.f32 %v629_v8, %v1976_v41 }
 0x7cc   :  { %vm557_vm4 = vmor %vm555_vm3, %vm556_vm2 }
 0x7cd   :  { %v552_v12 = vsub.f32 1.0, %v551_v11 }
 0x7cf   :  { %v553_v13 = vmul.f32 %v1457_v10, %v552_v12 }
 0x7d1   :  { %v554_v14 = vadd.f32 %v1457_v10, %v553_v13 }
 0x7d3   :  { %v558_v17 = vsel %vm557_vm4, %v1457_v10, %v554_v14 }
 0x7d4   :  { %v563_v20 = vsel %vm560_vm5, %v562_v18, %v558_v17 }
 0x7d5   :  { %v566_v26 = vmul.f32 %v563_v20, %v1971_v27 }
 0x809   :  { %v635_v7 = vpop.permute.xlu2 %634 }
 0x80a   :  { %v637_v9 = vmul.f32 %v635_v7, %v629_v8 }
 0x80c   :  { %639 = vrot.lane.b32.xlu1 %v637_v9, %s1723_s8 }
 0x829   :  { %v569_v19 = vpop.permute.xlu0 %568 }
 0x82a   :  { %v571_v21 = vmul.f32 %v569_v19, %v563_v20 }
 0x82c   :  { %573 = vrot.lane.b32.xlu2 %v571_v21, %s1723_s8 }
 0x87e   :  { %v640_v23 = vpop.permute.xlu1 %639 }
 0x87f   :  { %v2006_v24 = vadd.f32 %v640_v23, %v632_v22 }
 0x881   :  { %1458 = vtanh.f32 %v2006_v24 }
 0x886   :  { %v574_v28 = vpop.permute.xlu2 %573 }
 0x887   :  { %v1459_v30 = vpop.eup %1458  ;;  %v2010_v32 = vadd.f32 %v574_v28, %v566_v26 }
 0x888   :  { %645 = vrot.lane.b32.xlu0 %v1459_v30, %s1722_s5 }
 0x889   :  { %1460 = vtanh.f32 %v2010_v32 }
 0x88f   :  { %v1461_v43 = vpop.eup %1460 }
 0x890   :  { %579 = vrot.lane.b32.xlu1 %v1461_v43, %s1722_s5 }
 0x8fa   :  { %v646_v31 = vpop.permute.xlu0 %645 }
 0x8fb   :  { %v648_v41 = vmul.f32 %v646_v31, %v629_v8 }
 0x8fd   :  { %650 = vrot.lane.b32.xlu2 %v648_v41, %s1723_s8 }
 0x902   :  { %v580_v25 = vpop.permute.xlu1 %579 }
 0x903   :  { %v2016_v44 = vmul.f32 %v580_v25, %v563_v20 }
 0x905   :  { %653 = vrot.lane.b32.xlu0 %v2016_v44, %s1722_s5 }
 0x957   :  { %v651_v27 = vpop.permute.xlu2 %650 }
 0x958   :  { %1372 = vmatmul.msk.f32.vlgmr.msra.gmra.mxu0 %vm186_vm6, %v651_v27 }
 0x977   :  { %v654_v47 = vpop.permute.xlu0 %653 }
 0x978   :  { %v656_v29 = vsel %vm186_vm6, %v651_v27, %v654_v47 }
 0x979   :  { %1370 = vmatmul.msk.f32.vlgmr.msrb.gmra.mxu2 %vm253_vm7, %v656_v29 }
 0x97a   :  { %1204 = vmatpush.msrb.mxu2 %v1840_v33 }
 0x97c   :  { %1205 = vmatpush.msrb.mxu2 %v1845_v34 }
 0x97e   :  { %1206 = vmatpush.msrb.mxu2 %v1852_v35 }
 0x980   :  { %1207 = vmatpush.msrb.mxu2 %v1860_v36 }
 0x982   :  { %1208 = vmatpush.msrb.mxu2 %v1868_v37 }
 0x984   :  { %1209 = vmatpush.msrb.mxu2 %v1876_v38 }
 0x986   :  { %1210 = vmatpush.msrb.mxu2 %v1884_v39 }
 0x988   :  { %1211 = vmatpush.msrb.mxu2 %v1897_v42 }
 0x9d5   :  { %v742_v2 = vpop.f32.mrf.mxu0 }
 0x9d6   :  { %v745_v3 = vadd.f32 %v742_v2, %v722_v48 }
 0x9d8   :  { %1462 = vtanh.f32 %v745_v3  ;;  %v1373_v36 = vmul.f32 -1.442695, %v745_v3 }
 0x9de   :  { %v1463_v49 = vpop.eup %1462 }
 0x9df   :  { %768 = vrot.lane.b32.xlu1 %v1463_v49, %s1722_s5 }
 0x9fc   :  { %v677_v33 = vpop.f32.mrf.mxu2 }
 0x9fd   :  { %v678_v34 = vadd.f32 %v677_v33, %v1925_v45 }
 0x9ff   :  { %1464 = vtanh.f32 %v678_v34  ;;  %v1371_v39 = vmul.f32 -1.442695, %v678_v34 }
 0xa00   :  { %1466 = vpow2.f32 %v1373_v36 }
 0xa05   :  { %v1465_v35 = vpop.eup %1464 }
 0xa06   :  { %702 = vrot.lane.b32.xlu2 %v1465_v35, %s1722_s5  ;;  %v1467_v37 = vpop.eup %1466 }
 0xa07   :  { %v749_v38 = vadd.f32 1.0, %v1467_v37 }
 0xa09   :  { %1468 = vrcp.f32 %v749_v38  ;;  %v761_v55 = vand.u32 2147483648, %v749_v38  ;;  %vm755_vm9 = vweird.f32 %v749_v38  ;;  %v759_v56 = vand.u32 2147483647, %v749_v38 }
 0xa0a   :  { %1470 = vpow2.f32 %v1371_v39 }
 0xa0b   :  { %v762_v59 = vor.u32 1.1754944e-38, %v761_v55  ;;  %vm760_vm11 = vcmp.eq.f32.partialorder %v759_v56, 8.507059e+37 }
 0xa0f   :  { %v1469_v42 = vpop.eup %1468 }
 0xa10   :  { %v1471_v4 = vpop.eup %1470  ;;  %v751_v50 = vmul.f32 %v1469_v42, %v749_v38  ;;  %vm756_vm8 = vweird.f32 %v1469_v42 }
 0xa11   :  { %v683_v5 = vadd.f32 1.0, %v1471_v4  ;;  %vm757_vm10 = vmor %vm755_vm9, %vm756_vm8 }
 0xa12   :  { %v752_v51 = vsub.f32 1.0, %v751_v50 }
 0xa13   :  { %1472 = vrcp.f32 %v683_v5  ;;  %v695_v6 = vand.u32 2147483648, %v683_v5  ;;  %vm689_vm13 = vweird.f32 %v683_v5  ;;  %v693_v7 = vand.u32 2147483647, %v683_v5 }
 0xa14   :  { %v753_v52 = vmul.f32 %v1469_v42, %v752_v51 }
 0xa15   :  { %v696_v9 = vor.u32 1.1754944e-38, %v695_v6  ;;  %vm694_vm15 = vcmp.eq.f32.partialorder %v693_v7, 8.507059e+37 }
 0xa16   :  { %v754_v54 = vadd.f32 %v1469_v42, %v753_v52 }
 0xa18   :  { %v758_v58 = vsel %vm757_vm10, %v1469_v42, %v754_v54 }
 0xa19   :  { %v1473_v53 = vpop.eup %1472  ;;  %v763_v60 = vsel %vm760_vm11, %v762_v59, %v758_v58 }
 0xa1a   :  { %v685_v57 = vmul.f32 %v1473_v53, %v683_v5  ;;  %vm690_vm12 = vweird.f32 %v1473_v53  ;;  %v766_v13 = vmul.f32 %v763_v60, %v2006_v24 }
 0xa1b   :  { %vm691_vm14 = vmor %vm689_vm13, %vm690_vm12 }
 0xa1c   :  { %v686_v62 = vsub.f32 1.0, %v685_v57 }
 0xa1e   :  { %v687_v0 = vmul.f32 %v1473_v53, %v686_v62 }
 0xa20   :  { %v688_v1 = vadd.f32 %v1473_v53, %v687_v0 }
 0xa22   :  { %v692_v8 = vsel %vm691_vm14, %v1473_v53, %v688_v1 }
 0xa23   :  { %v697_v11 = vsel %vm694_vm15, %v696_v9, %v692_v8 }
 0xa24   :  { %v700_v17 = vmul.f32 %v697_v11, %v2010_v32  ;;  %v856_v32 = vld [vmem:[#allocation2 + $0x5] sm:$0x1] }
 0xa51   :  { %v769_v61 = vpop.permute.xlu1 %768 }
 0xa52   :  { %v771_v63 = vmul.f32 %v769_v61, %v763_v60 }
 0xa54   :  { %773 = vrot.lane.b32.xlu0 %v771_v63, %s1723_s8 }
 0xa60   :  { %v703_v10 = vpop.permute.xlu2 %702 }
 0xa61   :  { %v705_v12 = vmul.f32 %v703_v10, %v697_v11 }
 0xa63   :  { %707 = vrot.lane.b32.xlu1 %v705_v12, %s1723_s8 }
 0xac6   :  { %v774_v14 = vpop.permute.xlu0 %773 }
 0xac7   :  { %v2037_v15 = vadd.f32 %v774_v14, %v766_v13 }
 0xac9   :  { %1474 = vtanh.f32 %v2037_v15 }
 0xacf   :  { %v1475_v16 = vpop.eup %1474 }
 0xad0   :  { %779 = vrot.lane.b32.xlu2 %v1475_v16, %s1722_s5 }
 0xad5   :  { %v708_v18 = vpop.permute.xlu1 %707 }
 0xad6   :  { %v2042_v19 = vadd.f32 %v708_v18, %v700_v17 }
 0xad8   :  { %1476 = vtanh.f32 %v2042_v19 }
 0xade   :  { %v1477_v20 = vpop.eup %1476 }
 0xadf   :  { %713 = vrot.lane.b32.xlu0 %v1477_v20, %s1722_s5  ;;  %v990_v20 = vld [vmem:[#allocation2 + $0x6] sm:$0x1] }
 0xb2a   :  { %v780_v21 = vpop.permute.xlu2 %779 }
 0xb2b   :  { %v782_v22 = vmul.f32 %v780_v21, %v763_v60 }
 0xb2d   :  { %784 = vrot.lane.b32.xlu1 %v782_v22, %s1723_s8 }
 0xb51   :  { %v714_v23 = vpop.permute.xlu0 %713 }
 0xb52   :  { %v2047_v24 = vmul.f32 %v714_v23, %v697_v11 }
 0xb54   :  { %787 = vrot.lane.b32.xlu2 %v2047_v24, %s1722_s5 }
 0xb9f   :  { %v785_v26 = vpop.permute.xlu1 %784 }
 0xba0   :  { %1376 = vmatmul.msk.f32.vlgmr.msra.gmra.mxu3 %vm186_vm6, %v785_v26 }
 0xbae   :  { %v788_v28 = vpop.permute.xlu2 %787 }
 0xbaf   :  { %v790_v30 = vsel %vm186_vm6, %v785_v26, %v788_v28 }
 0xbb0   :  { %1374 = vmatmul.msk.f32.vlgmr.msrb.gmra.mxu1 %vm253_vm7, %v790_v30 }
 0xc23   :  { %v876_v43 = vpop.f32.mrf.mxu3 }
 0xc24   :  { %v879_v31 = vadd.f32 %v876_v43, %v856_v32 }
 0xc26   :  { %1478 = vtanh.f32 %v879_v31  ;;  %v1377_v29 = vmul.f32 -1.442695, %v879_v31 }
 0xc2c   :  { %v1479_v41 = vpop.eup %1478 }
 0xc2d   :  { %902 = vrot.lane.b32.xlu0 %v1479_v41, %s1722_s5  ;;  %v811_v25 = vpop.f32.mrf.mxu1 }
 0xc2e   :  { %v812_v27 = vadd.f32 %v811_v25, %v1925_v45 }
 0xc30   :  { %1480 = vtanh.f32 %v812_v27  ;;  %v1375_v2 = vmul.f32 -1.442695, %v812_v27 }
 0xc31   :  { %1482 = vpow2.f32 %v1377_v29 }
 0xc32   :  { %1484 = vpow2.f32 %v1375_v2 }
 0xc36   :  { %v1481_v47 = vpop.eup %1480 }
 0xc37   :  { %836 = vrot.lane.b32.xlu1 %v1481_v47, %s1722_s5  ;;  %v1483_v48 = vpop.eup %1482 }
 0xc38   :  { %v883_v3 = vadd.f32 1.0, %v1483_v48  ;;  %v1485_v49 = vpop.eup %1484 }
 0xc39   :  { %v817_v34 = vadd.f32 1.0, %v1485_v49 }
 0xc3a   :  { %1486 = vrcp.f32 %v883_v3  ;;  %v895_v4 = vand.u32 2147483648, %v883_v3  ;;  %vm889_vm3 = vweird.f32 %v883_v3  ;;  %v893_v50 = vand.u32 2147483647, %v883_v3 }
 0xc3b   :  { %1488 = vrcp.f32 %v817_v34  ;;  %v829_v58 = vand.u32 2147483648, %v817_v34  ;;  %vm823_vm9 = vweird.f32 %v817_v34  ;;  %v827_v59 = vand.u32 2147483647, %v817_v34 }
 0xc3c   :  { %v896_v52 = vor.u32 1.1754944e-38, %v895_v4  ;;  %vm894_vm5 = vcmp.eq.f32.partialorder %v893_v50, 8.507059e+37 }
 0xc3d   :  { %v830_v61 = vor.u32 1.1754944e-38, %v829_v58  ;;  %vm828_vm11 = vcmp.eq.f32.partialorder %v827_v59, 8.507059e+37 }
 0xc40   :  { %v1487_v33 = vpop.eup %1486 }
 0xc41   :  { %v885_v35 = vmul.f32 %v1487_v33, %v883_v3  ;;  %v1489_v37 = vpop.eup %1488  ;;  %vm890_vm2 = vweird.f32 %v1487_v33 }
 0xc42   :  { %v819_v39 = vmul.f32 %v1489_v37, %v817_v34  ;;  %vm891_vm4 = vmor %vm889_vm3, %vm890_vm2  ;;  %vm824_vm8 = vweird.f32 %v1489_v37 }
 0xc43   :  { %v886_v36 = vsub.f32 1.0, %v885_v35  ;;  %vm825_vm10 = vmor %vm823_vm9, %vm824_vm8 }
 0xc44   :  { %v820_v5 = vsub.f32 1.0, %v819_v39 }
 0xc45   :  { %v887_v38 = vmul.f32 %v1487_v33, %v886_v36 }
 0xc46   :  { %v821_v53 = vmul.f32 %v1489_v37, %v820_v5 }
 0xc47   :  { %v888_v42 = vadd.f32 %v1487_v33, %v887_v38 }
 0xc48   :  { %v822_v57 = vadd.f32 %v1489_v37, %v821_v53 }
 0xc49   :  { %v892_v51 = vsel %vm891_vm4, %v1487_v33, %v888_v42 }
 0xc4a   :  { %v897_v55 = vsel %vm894_vm5, %v896_v52, %v892_v51  ;;  %v826_v60 = vsel %vm825_vm10, %v1489_v37, %v822_v57 }
 0xc4b   :  { %v831_v63 = vsel %vm828_vm11, %v830_v61, %v826_v60  ;;  %v900_v1 = vmul.f32 %v897_v55, %v2037_v15 }
 0xc4c   :  { %v834_v9 = vmul.f32 %v831_v63, %v2042_v19 }
 0xc9f   :  { %v903_v54 = vpop.permute.xlu0 %902 }
 0xca0   :  { %v905_v56 = vmul.f32 %v903_v54, %v897_v55 }
 0xca2   :  { %907 = vrot.lane.b32.xlu2 %v905_v56, %s1723_s8 }
 0xca9   :  { %v837_v62 = vpop.permute.xlu1 %836 }
 0xcaa   :  { %v839_v0 = vmul.f32 %v837_v62, %v831_v63 }
 0xcac   :  { %841 = vrot.lane.b32.xlu0 %v839_v0, %s1723_s8 }
 0xcfc   :  { %v908_v6 = vpop.permute.xlu2 %907 }
 0xcfd   :  { %v2060_v7 = vadd.f32 %v908_v6, %v900_v1 }
 0xcff   :  { %1490 = vtanh.f32 %v2060_v7 }
 0xd05   :  { %v1491_v8 = vpop.eup %1490 }
 0xd06   :  { %913 = vrot.lane.b32.xlu1 %v1491_v8, %s1722_s5 }
 0xd1e   :  { %v842_v10 = vpop.permute.xlu0 %841 }
 0xd1f   :  { %v2065_v11 = vadd.f32 %v842_v10, %v834_v9 }
 0xd21   :  { %1492 = vtanh.f32 %v2065_v11 }
 0xd27   :  { %v1493_v12 = vpop.eup %1492 }
 0xd28   :  { %847 = vrot.lane.b32.xlu2 %v1493_v12, %s1722_s5  ;;  %v1124_v12 = vld [vmem:[#allocation2 + $0x7] sm:$0x1] }
 0xd78   :  { %v914_v13 = vpop.permute.xlu1 %913 }
 0xd79   :  { %v916_v14 = vmul.f32 %v914_v13, %v897_v55 }
 0xd7b   :  { %918 = vrot.lane.b32.xlu0 %v916_v14, %s1723_s8 }
 0xd82   :  { %v848_v15 = vpop.permute.xlu2 %847 }
 0xd83   :  { %v2070_v16 = vmul.f32 %v848_v15, %v831_v63 }
 0xd85   :  { %921 = vrot.lane.b32.xlu1 %v2070_v16, %s1722_s5 }
 0xded   :  { %v919_v17 = vpop.permute.xlu0 %918 }
 0xdee   :  { %1380 = vmatmul.msk.f32.vlgmr.msra.gmra.mxu2 %vm186_vm6, %v919_v17 }
 0xdf7   :  { %v922_v18 = vpop.permute.xlu1 %921 }
 0xdf8   :  { %v924_v19 = vsel %vm186_vm6, %v919_v17, %v922_v18  ;;  %v2101_v18 = vld [vmem:[#allocation12] sm:$0x1] }
 0xdf9   :  { %1378 = vmatmul.msk.f32.vlgmr.msrb.gmra.mxu0 %vm253_vm7, %v924_v19 }
 0xe71   :  { %v1010_v21 = vpop.f32.mrf.mxu2 }
 0xe72   :  { %v1013_v22 = vadd.f32 %v1010_v21, %v990_v20 }
 0xe74   :  { %1494 = vtanh.f32 %v1013_v22  ;;  %v1381_v41 = vmul.f32 -1.442695, %v1013_v22 }
 0xe76   :  { %v945_v23 = vpop.f32.mrf.mxu0 }
 0xe77   :  { %v946_v26 = vadd.f32 %v945_v23, %v1925_v45 }
 0xe79   :  { %1496 = vtanh.f32 %v946_v26  ;;  %v1379_v32 = vmul.f32 -1.442695, %v946_v26 }
 0xe7a   :  { %v1495_v28 = vpop.eup %1494 }
 0xe7b   :  { %1036 = vrot.lane.b32.xlu0 %v1495_v28, %s1722_s5  ;;  %1498 = vpow2.f32 %v1379_v32 }
 0xe7f   :  { %v1497_v30 = vpop.eup %1496 }
 0xe80   :  { %970 = vrot.lane.b32.xlu2 %v1497_v30, %s1722_s5 }
 0xe81   :  { %v1499_v43 = vpop.eup %1498 }
 0xe82   :  { %v951_v31 = vadd.f32 1.0, %v1499_v43 }
 0xe84   :  { %1500 = vrcp.f32 %v951_v31  ;;  %v963_v3 = vand.u32 2147483648, %v951_v31  ;;  %vm957_vm13 = vweird.f32 %v951_v31  ;;  %v961_v49 = vand.u32 2147483647, %v951_v31 }
 0xe85   :  { %1502 = vpow2.f32 %v1381_v41 }
 0xe86   :  { %v964_v35 = vor.u32 1.1754944e-38, %v963_v3  ;;  %vm962_vm15 = vcmp.eq.f32.partialorder %v961_v49, 8.507059e+37 }
 0xe8a   :  { %v1501_v25 = vpop.eup %1500 }
 0xe8b   :  { %v953_v27 = vmul.f32 %v1501_v25, %v951_v31  ;;  %v1503_v47 = vpop.eup %1502  ;;  %vm958_vm12 = vweird.f32 %v1501_v25 }
 0xe8c   :  { %v1017_v48 = vadd.f32 1.0, %v1503_v47  ;;  %vm959_vm14 = vmor %vm957_vm13, %vm958_vm12 }
 0xe8d   :  { %v954_v29 = vsub.f32 1.0, %v953_v27 }
 0xe8e   :  { %1504 = vrcp.f32 %v1017_v48  ;;  %v1029_v5 = vand.u32 2147483648, %v1017_v48  ;;  %vm1023_vm3 = vweird.f32 %v1017_v48  ;;  %v1027_v51 = vand.u32 2147483647, %v1017_v48 }
 0xe8f   :  { %v955_v45 = vmul.f32 %v1501_v25, %v954_v29 }
 0xe90   :  { %v1030_v53 = vor.u32 1.1754944e-38, %v1029_v5  ;;  %vm1028_vm5 = vcmp.eq.f32.partialorder %v1027_v51, 8.507059e+37 }
 0xe91   :  { %v956_v2 = vadd.f32 %v1501_v25, %v955_v45 }
 0xe93   :  { %v960_v34 = vsel %vm959_vm14, %v1501_v25, %v956_v2 }
 0xe94   :  { %v1505_v33 = vpop.eup %1504  ;;  %v965_v37 = vsel %vm962_vm15, %v964_v35, %v960_v34 }
 0xe95   :  { %v1019_v38 = vmul.f32 %v1505_v33, %v1017_v48  ;;  %vm1024_vm2 = vweird.f32 %v1505_v33  ;;  %v968_v60 = vmul.f32 %v965_v37, %v2065_v11 }
 0xe96   :  { %vm1025_vm4 = vmor %vm1023_vm3, %vm1024_vm2 }
 0xe97   :  { %v1020_v42 = vsub.f32 1.0, %v1019_v38 }
 0xe99   :  { %v1021_v4 = vmul.f32 %v1505_v33, %v1020_v42 }
 0xe9b   :  { %v1022_v50 = vadd.f32 %v1505_v33, %v1021_v4 }
 0xe9d   :  { %v1026_v52 = vsel %vm1025_vm4, %v1505_v33, %v1022_v50 }
 0xe9e   :  { %v1031_v55 = vsel %vm1028_vm5, %v1030_v53, %v1026_v52  ;;  %vm318_vm5 = vcmask 253952  }
 0xe9f   :  { %v1034_v57 = vmul.f32 %v1031_v55, %v2060_v7 }
 0xeda   :  { %v971_v36 = vpop.permute.xlu2 %970 }
 0xedb   :  { %v973_v39 = vmul.f32 %v971_v36, %v965_v37 }
 0xedd   :  { %975 = vrot.lane.b32.xlu1 %v973_v39, %s1723_s8 }
 0xeed   :  { %v1037_v54 = vpop.permute.xlu0 %1036 }
 0xeee   :  { %v1039_v56 = vmul.f32 %v1037_v54, %v1031_v55 }
 0xef0   :  { %1041 = vrot.lane.b32.xlu2 %v1039_v56, %s1723_s8 }
 0xf4a   :  { %v1042_v58 = vpop.permute.xlu2 %1041 }
 0xf4b   :  { %v2083_v59 = vadd.f32 %v1042_v58, %v1034_v57 }
 0xf4d   :  { %1506 = vtanh.f32 %v2083_v59 }
 0xf4f   :  { %v976_v61 = vpop.permute.xlu1 %975 }
 0xf50   :  { %v2087_v62 = vadd.f32 %v976_v61, %v968_v60 }
 0xf52   :  { %1508 = vtanh.f32 %v2087_v62 }
 0xf53   :  { %v1507_v63 = vpop.eup %1506 }
 0xf54   :  { %1047 = vrot.lane.b32.xlu1 %v1507_v63, %s1722_s5 }
 0xf58   :  { %v1509_v0 = vpop.eup %1508 }
 0xf59   :  { %981 = vrot.lane.b32.xlu0 %v1509_v0, %s1722_s5 }
 0xfc6   :  { %v1048_v1 = vpop.permute.xlu1 %1047 }
 0xfc7   :  { %v1050_v6 = vmul.f32 %v1048_v1, %v1031_v55 }
 0xfc9   :  { %1052 = vrot.lane.b32.xlu2 %v1050_v6, %s1723_s8 }
 0xfcb   :  { %v982_v7 = vpop.permute.xlu0 %981 }
 0xfcc   :  { %v2093_v8 = vmul.f32 %v982_v7, %v965_v37 }
 0xfce   :  { %1055 = vrot.lane.b32.xlu0 %v2093_v8, %s1722_s5 }
0x1023   :  { %v1053_v9 = vpop.permute.xlu2 %1052 }
0x1024   :  { %1384 = vmatmul.msk.f32.vlgmr.msra.gmra.mxu1 %vm186_vm6, %v1053_v9 }
0x1040   :  { %v1056_v10 = vpop.permute.xlu0 %1055 }
0x1041   :  { %v1058_v11 = vsel %vm186_vm6, %v1053_v9, %v1056_v10 }
0x1042   :  { %1382 = vmatmul.msk.f32.vlgmr.msrb.gmra.mxu3 %vm253_vm7, %v1058_v11 }
0x10a1   :  { %v1144_v13 = vpop.f32.mrf.mxu1 }
0x10a2   :  { %v1147_v14 = vadd.f32 %v1144_v13, %v1124_v12 }
0x10a4   :  { %1510 = vtanh.f32 %v1147_v14  ;;  %v1385_v21 = vmul.f32 -1.442695, %v1147_v14 }
0x10aa   :  { %v1511_v15 = vpop.eup %1510 }
0x10ab   :  { %1170 = vrot.lane.b32.xlu2 %v1511_v15, %s1722_s5 }
0x10c5   :  { %v1079_v17 = vpop.f32.mrf.mxu3 }
0x10c6   :  { %v1080_v19 = vadd.f32 %v2101_v18, %v1079_v17 }
0x10c8   :  { %1512 = vtanh.f32 %v1080_v19  ;;  %v1383_v45 = vmul.f32 -1.442695, %v1080_v19 }
0x10c9   :  { %1514 = vpow2.f32 %v1385_v21 }
0x10ce   :  { %v1513_v20 = vpop.eup %1512 }
0x10cf   :  { %1104 = vrot.lane.b32.xlu1 %v1513_v20, %s1722_s5  ;;  %v1515_v22 = vpop.eup %1514 }
0x10d0   :  { %v1151_v23 = vadd.f32 1.0, %v1515_v22 }
0x10d2   :  { %1516 = vrcp.f32 %v1151_v23  ;;  %v1163_v31 = vand.u32 2147483648, %v1151_v23  ;;  %vm1157_vm9 = vweird.f32 %v1151_v23  ;;  %v1161_v41 = vand.u32 2147483647, %v1151_v23 }
0x10d3   :  { %1518 = vpow2.f32 %v1383_v45  ;;  %v1290_v45 = vld [vmem:[#allocation15] sm:$0x3f] }
0x10d4   :  { %v1164_v27 = vor.u32 1.1754944e-38, %v1163_v31  ;;  %vm1162_vm11 = vcmp.eq.f32.partialorder %v1161_v41, 8.507059e+37  ;;  %1389 = vmatpush.msk.msrb.mxu1 %vm160_vm0, %v1290_v45  ;;  %vm1318_vm0 = vcmask 195584  }
0x10d8   :  { %v1517_v26 = vpop.eup %1516 }
0x10d9   :  { %v1153_v28 = vmul.f32 %v1517_v26, %v1151_v23  ;;  %vm1158_vm8 = vweird.f32 %v1517_v26  ;;  %v1519_v2 = vpop.eup %1518 }
0x10da   :  { %vm1159_vm10 = vmor %vm1157_vm9, %vm1158_vm8  ;;  %v1085_v3 = vadd.f32 1.0, %v1519_v2  ;;  %v1535_v2 = vld [vmem:[#allocation5] sm:$0xff] }
0x10db   :  { %v1154_v30 = vsub.f32 1.0, %v1153_v28  ;;  %1390 = vmatmul.msk.f32.vlgmr.msrb.gmra.mxu1 %vm156_vm1, %v1535_v2  ;;  %vm1345_vm1 = vcmask 31744  }
0x10dc   :  { %1520 = vrcp.f32 %v1085_v3  ;;  %v1097_v37 = vand.u32 2147483648, %v1085_v3  ;;  %vm1091_vm13 = vweird.f32 %v1085_v3  ;;  %v1095_v38 = vand.u32 2147483647, %v1085_v3 }
0x10dd   :  { %v1155_v32 = vmul.f32 %v1517_v26, %v1154_v30 }
0x10de   :  { %v1098_v42 = vor.u32 1.1754944e-38, %v1097_v37  ;;  %vm1096_vm15 = vcmp.eq.f32.partialorder %v1095_v38, 8.507059e+37  ;;  %v1405_v37 = vld [vmem:[#allocation13] ss:$0 sm:$0xff] }
0x10df   :  { %v1156_v43 = vadd.f32 %v1517_v26, %v1155_v32 }
0x10e1   :  { %v1160_v25 = vsel %vm1159_vm10, %v1517_v26, %v1156_v43 }
0x10e2   :  { %v1165_v29 = vsel %vm1162_vm11, %v1164_v27, %v1160_v25  ;;  %v1521_v49 = vpop.eup %1520 }
0x10e3   :  { %v1087_v33 = vmul.f32 %v1521_v49, %v1085_v3  ;;  %vm1092_vm12 = vweird.f32 %v1521_v49  ;;  %v1168_v51 = vmul.f32 %v1165_v29, %v2083_v59  ;;  %v1259_v3 = vld [vmem:[%s2177_s6] sm:$0xff] }
0x10e4   :  { %vm1093_vm14 = vmor %vm1091_vm13, %vm1092_vm12 }
0x10e5   :  { %v1088_v34 = vsub.f32 1.0, %v1087_v33 }
0x10e7   :  { %v1089_v35 = vmul.f32 %v1521_v49, %v1088_v34 }
0x10e9   :  { %v1090_v36 = vadd.f32 %v1521_v49, %v1089_v35  ;;  %v1316_v35 = vld [vmem:[%s2180_s9 + $0x8] sm:$0xff] }
0x10eb   :  { %v1094_v39 = vsel %vm1093_vm14, %v1521_v49, %v1090_v36  ;;  %v1317_v49 = vld [vmem:[%s2180_s9 + $0x10] sm:$0xff]  ;;  %v1315_v36 = vld [vmem:[%s2180_s9] sm:$0xff] }
0x10ec   :  { %v1099_v50 = vsel %vm1096_vm15, %v1098_v42, %v1094_v39  ;;  %1335 = vmatpush.msra.mxu3 %v1317_v49 }
0x10ed   :  { %v1102_v55 = vmul.f32 %v1099_v50, %v2087_v62 }
0x10ee   :  { %1336 = vmatpush.msra.mxu3 %v1316_v35 }
0x10f0   :  { %1337 = vmatpush.msra.mxu3 %v1315_v36 }
0x1105   :  { %v1171_v47 = vpop.permute.xlu2 %1170 }
0x1106   :  { %v1173_v48 = vmul.f32 %v1171_v47, %v1165_v29 }
0x1108   :  { %1175 = vrot.lane.b32.xlu1 %v1173_v48, %s1723_s8  ;;  %v1262_v48 = vld [vmem:[%s2177_s6 + $0x18] sm:$0xff] }
0x1109   :  { %1282 = vmatpush.msra.mxu0 %v1262_v48 }
0x1141   :  { %v1105_v4 = vpop.permute.xlu1 %1104 }
0x1142   :  { %v1107_v5 = vmul.f32 %v1105_v4, %v1099_v50 }
0x1144   :  { %1109 = vrot.lane.b32.xlu0 %v1107_v5, %s1723_s8 }
0x1158   :  { %v1311_v39 = vpop.f32.mrf.mxu1 }
0x117a   :  { %v1176_v52 = vpop.permute.xlu1 %1175 }
0x117b   :  { %v1178_v53 = vadd.f32 %v1176_v52, %v1168_v51 }
0x117d   :  { %1522 = vtanh.f32 %v1178_v53 }
0x1183   :  { %v1523_v54 = vpop.eup %1522 }
0x1184   :  { %1181 = vrot.lane.b32.xlu0 %v1523_v54, %s1722_s5 }
0x11b6   :  { %v1110_v56 = vpop.permute.xlu0 %1109 }
0x11b7   :  { %v1112_v57 = vadd.f32 %v1110_v56, %v1102_v55 }
0x11b9   :  { %1524 = vtanh.f32 %v1112_v57 }
0x11bf   :  { %v1525_v58 = vpop.eup %1524 }
0x11c0   :  { %1115 = vrot.lane.b32.xlu2 %v1525_v58, %s1722_s5 }
0x11f6   :  { %v1182_v60 = vpop.permute.xlu0 %1181 }
0x11f7   :  { %v1184_v61 = vmul.f32 %v1182_v60, %v1165_v29 }
0x11f9   :  { %1186 = vrot.lane.b32.xlu1 %v1184_v61, %s1723_s8 }
0x121a   :  { %v1116_v63 = vpop.permute.xlu2 %1115 }
0x121b   :  { %v1118_v59 = vmul.f32 %v1116_v63, %v1099_v50  ;;  %v1342_v50 = vstv %s2181_s10 }
0x121d   :  { %1189 = vrot.lane.b32.xlu2 %v1118_v59, %s1722_s5 }
0x126b   :  { %v1187_v0 = vpop.permute.xlu1 %1186 }
0x1277   :  { %v1190_v1 = vpop.permute.xlu2 %1189 }
0x1278   :  { %v1192_v6 = vsel %vm186_vm6, %v1187_v0, %v1190_v1 }
0x1279   :  { %1386 = vmatmul.msk.f32.vlgmr.msrb.gmra.mxu2 %vm253_vm7, %v1192_v6 }
0x12fc   :  { %v1213_v62 = vpop.f32.mrf.mxu2 }
0x12fd   :  { %v1214_v7 = vadd.f32 %v2101_v18, %v1213_v62 }
0x12ff   :  { %1526 = vtanh.f32 %v1214_v7  ;;  %v1387_v10 = vmul.f32 -1.442695, %v1214_v7 }
0x1301   :  { %1528 = vpow2.f32 %v1387_v10 }
0x1305   :  { %v1527_v9 = vpop.eup %1526 }
0x1306   :  { %1238 = vrot.lane.b32.xlu0 %v1527_v9, %s1722_s5 }
0x1307   :  { %v1529_v11 = vpop.eup %1528 }
0x1308   :  { %v1219_v12 = vadd.f32 1.0, %v1529_v11 }
0x130a   :  { %1530 = vrcp.f32 %v1219_v12  ;;  %v1231_v19 = vand.u32 2147483648, %v1219_v12  ;;  %vm1225_vm2 = vweird.f32 %v1219_v12  ;;  %v1229_v20 = vand.u32 2147483647, %v1219_v12 }
0x130c   :  { %v1232_v21 = vor.u32 1.1754944e-38, %v1231_v19  ;;  %vm1230_vm4 = vcmp.eq.f32.partialorder %v1229_v20, 8.507059e+37 }
0x130e   :  { %315 = vrot.lane.b32.xlu0 %v1941_v40, %s1723_s8 }
0x1310   :  { %v1531_v13 = vpop.eup %1530 }
0x1311   :  { %v1221_v14 = vmul.f32 %v1531_v13, %v1219_v12  ;;  %vm1226_vm7 = vweird.f32 %v1531_v13 }
0x1312   :  { %vm1227_vm3 = vmor %vm1225_vm2, %vm1226_vm7 }
0x1313   :  { %v1222_v15 = vsub.f32 1.0, %v1221_v14 }
0x1315   :  { %v1223_v17 = vmul.f32 %v1531_v13, %v1222_v15 }
0x1316   :  { %718 = vrot.lane.b32.xlu0 %v2047_v24, %s1723_s8 }
0x1317   :  { %v1224_v18 = vadd.f32 %v1531_v13, %v1223_v17 }
0x1319   :  { %v1228_v40 = vsel %vm1227_vm3, %v1531_v13, %v1224_v18 }
0x131a   :  { %v1233_v22 = vsel %vm1230_vm4, %v1232_v21, %v1228_v40 }
0x131b   :  { %v1236_v32 = vmul.f32 %v1233_v22, %v1112_v57 }
0x131e   :  { %1120 = vrot.lane.b32.xlu0 %v1118_v59, %s1723_s8 }
0x1378   :  { %v1239_v24 = vpop.permute.xlu0 %1238 }
0x1379   :  { %v1241_v23 = vmul.f32 %v1239_v24, %v1233_v22 }
0x137b   :  { %1243 = vrot.lane.b32.xlu1 %v1241_v23, %s1723_s8 }
0x1380   :  { %v316_v26 = vpop.permute.xlu0 %315 }
0x1381   :  { %319 = vst.msk [vmem:[#allocation3] sm:$0x1] %vm318_vm5, %v316_v26 }
0x1383   :  { %450 = vrot.lane.b32.xlu1 %v1980_v46, %s1723_s8 }
0x1388   :  { %v719_v28 = vpop.permute.xlu0 %718 }
0x1389   :  { %721 = vst.msk [vmem:[#allocation3 + $0x3] sm:$0x1] %vm318_vm5, %v719_v28 }
0x138b   :  { %852 = vrot.lane.b32.xlu1 %v2070_v16, %s1723_s8 }
0x1390   :  { %v1121_v30 = vpop.permute.xlu0 %1120 }
0x1391   :  { %1123 = vst.msk [vmem:[#allocation3 + $0x6] sm:$0x1] %vm318_vm5, %v1121_v30 }
0x13ed   :  { %v1244_v43 = vpop.permute.xlu1 %1243 }
0x13ee   :  { %v1246_v31 = vadd.f32 %v1244_v43, %v1236_v32 }
0x13f0   :  { %1532 = vtanh.f32 %v1246_v31 }
0x13f5   :  { %v451_v41 = vpop.permute.xlu1 %450 }
0x13f6   :  { %v1533_v25 = vpop.eup %1532  ;;  %453 = vst.msk [vmem:[#allocation3 + $0x1] sm:$0x1] %vm318_vm5, %v451_v41 }
0x13f7   :  { %1249 = vrot.lane.b32.xlu2 %v1533_v25, %s1722_s5 }
0x13fd   :  { %v853_v46 = vpop.permute.xlu1 %852 }
0x13fe   :  { %855 = vst.msk [vmem:[#allocation3 + $0x4] sm:$0x1] %vm318_vm5, %v853_v46 }
0x13ff   :  { %584 = vrot.lane.b32.xlu2 %v2016_v44, %s1723_s8  ;;  %v1261_v44 = vld [vmem:[%s2177_s6 + $0x10] sm:$0xff] }
0x1400   :  { %1283 = vmatpush.msra.mxu0 %v1261_v44 }
0x1407   :  { %986 = vrot.lane.b32.xlu2 %v2093_v8, %s1723_s8  ;;  %v1260_v8 = vld [vmem:[%s2177_s6 + $0x8] sm:$0xff] }
0x1408   :  { %1284 = vmatpush.msra.mxu0 %v1260_v8 }
0x140a   :  { %1285 = vmatpush.msra.mxu0 %v1259_v3 }
0x1451   :  { %v1250_v16 = vpop.permute.xlu2 %1249 }
0x1452   :  { %v1252_v27 = vmul.f32 %v1250_v16, %v1233_v22 }
0x1454   :  { %1254 = vrot.lane.b32.xlu1 %v1252_v27, %s1723_s8 }
0x1459   :  { %v585_v47 = vpop.permute.xlu2 %584 }
0x145a   :  { %587 = vst.msk [vmem:[#allocation3 + $0x2] sm:$0x1] %vm318_vm5, %v585_v47 }
0x1461   :  { %v987_v29 = vpop.permute.xlu2 %986 }
0x1462   :  { %989 = vst.msk [vmem:[#allocation3 + $0x5] sm:$0x1] %vm318_vm5, %v987_v29 }
0x14c6   :  { %v1255_v33 = vpop.permute.xlu1 %1254 }
0x14c7   :  { %1257 = vst.msk [vmem:[#allocation3 + $0x7] sm:$0x1] %vm318_vm5, %v1255_v33 }
0x14ce   :  { %v1258_v34 = vld [vmem:[#allocation3] sm:$0xff] }
0x14cf   :  { %1388 = vmatmul.msk.f32.vlgmr.msra.gmra.mxu0 %vm186_vm6, %v1258_v34 }
0x154c   :  { %v1287_v38 = vpop.f32.mrf.mxu0 }
0x154d   :  { %v1288_v42 = vadd.f32 %v1405_v37, %v1287_v38 }
0x154f   :  { %v1314_v4 = vmul.f32 %v1311_v39, %v1288_v42 }
0x1551   :  { %1391 = vmatmul.msk.f32.vlgmr.msra.gmra.mxu3 %vm1318_vm0, %v1314_v4 }
0x15d4   :  { %v1339_v5 = vpop.f32.mrf.mxu3 }
0x15d5   :  { %v1343_v51 = vmul.f32 %v1342_v50, %v1339_v5 }
0x15d7   :  { %v1344_v52 = vadd.f32 %v1535_v2, %v1343_v51 }
0x15d9   :  { %1346 = vst.msk [vmem:[%s2182_s11] sm:$0xff] %vm1345_vm1, %v1344_v52 }
0x15da   :  { %1351 = vsyncpa [#allocation6], 1 }
0x15db   :  { %1352 = vsyncpa [#allocation8], 1 }
0x15dc   :  { %1353 = vsyncpa [#allocation11], 1 }
0x15dd   :  { %1354 = vsyncpa [#allocation14], 1 }

</bundles_post_ra>
